<compile_context>
chip_gen: v5e
topology: v5e:2x2
jax: 0.10.0
libtpu: 0.0.40
codegen_flags: <defaults>
</compile_context>

<pallas_src>
import functools

import numpy as np
import jax
import jax.numpy as jnp
from jax.experimental import pallas as pl
from jax.experimental.pallas import tpu as pltpu


# ----------------------------------------------------------------------------
# Static (trace-time, NumPy) helper tables.
# ----------------------------------------------------------------------------
def _adaptive_pool_matrix_1d(in_size, out_size):
    m = np.zeros((in_size, out_size), dtype=np.float32)
    for i in range(out_size):
        s = (i * in_size) // out_size
        e = -((-(i + 1) * in_size) // out_size)      # ceil((i+1)*in/out)
        m[s:e, i] = 1.0 / float(e - s)
    return m


def _adaptive_pool_matrix_2d(h, w, out_h, out_w):
    mh = _adaptive_pool_matrix_1d(h, out_h)          # (H, out_h)
    mw = _adaptive_pool_matrix_1d(w, out_w)          # (W, out_w)
    # entry (h*W + w, i*out_w + j) = mh[h, i] * mw[w, j]  -> exact AdaptiveAvgPool2d
    return np.kron(mh, mw)                           # (H*W, out_h*out_w)


def _conv3x3_shift_masks(n, h, w):
    """Static lane shifts + 0/1 validity masks for a 3x3 / pad=1 conv applied to a
    channel-major, spatially flattened input of shape (Cin, n*h*w)."""
    nhw = n * h * w
    rr, cc = np.meshgrid(np.arange(h), np.arange(w), indexing="ij")
    shifts = []
    masks = np.zeros((9, 1, nhw), np.float32)
    idx = 0
    for dh in (-1, 0, 1):
        for dw in (-1, 0, 1):
            off = dh * w + dw                        # lane offset of the source tap
            # pltpu.roll follows jnp.roll semantics: out[p] = x[(p - shift) mod nhw],
            # so shift = -off makes out[p] = x[p + off].
            shifts.append((-off) % nhw)
            valid = ((rr + dh >= 0) & (rr + dh < h) &
                     (cc + dw >= 0) & (cc + dw < w)).astype(np.float32)
            masks[idx, 0, :] = np.tile(valid.reshape(-1), n)
            idx += 1
    return tuple(shifts), masks


# ----------------------------------------------------------------------------
# Fused forward kernel:
#   conv3x3(pad=1) + bias + ReLU  ->  AdaptiveAvgPool2d(6,6)  ->  NCHW flatten
#   ->  Linear + ReLU  ->  Linear
# All intermediates (feature map, pooled map, hidden activations) stay on-chip.
# ----------------------------------------------------------------------------
def _fused_forward_kernel(x_ref, wc_ref, bc_ref, mask_ref, pool_ref,
                          w1_ref, b1_ref, w2_ref, b2_ref, out_ref,
                          *, shifts, n_batch, hw, cout):
    nhw = n_batch * hw
    x = x_ref[...]                                   # (Cin, N*H*W) f32

    # ---- Conv2d(3x3, pad=1): 9 masked lane-shifted taps, accumulated on the MXU.
    acc = jnp.zeros((cout, nhw), dtype=jnp.float32)
    for idx, shift in enumerate(shifts):
        src = x if shift == 0 else pltpu.roll(x, shift=shift, axis=1)
        src = src * mask_ref[idx]                    # (1, nhw) mask, zero padding taps
        acc = acc + jnp.dot(wc_ref[idx], src,        # (Cout, Cin) @ (Cin, nhw)
                            preferred_element_type=jnp.float32)
    feat = jnp.maximum(acc + bc_ref[...], 0.0)       # (Cout, N*H*W), lane-dense

    pool_m = pool_ref[...]                           # (H*W, 36)
    b1 = b1_ref[...]                                 # (1, hidden)
    w2 = w2_ref[...]                                 # (hidden, out_dim)
    b2 = b2_ref[...]                                 # (1, out_dim)

    # ---- Per image: pool -> flatten (NCHW order) -> fc1 + ReLU -> fc2.
    for n in range(n_batch):
        feat_n = feat[:, n * hw:(n + 1) * hw]        # (Cout, H*W), 128-aligned slice
        pooled = jnp.dot(feat_n, pool_m,
                         preferred_element_type=jnp.float32)   # (Cout, 36)
        h1 = b1
        for c in range(cout):                        # reproduces flat[n, c*36 + j]
            h1 = h1 + jnp.dot(pooled[c:c + 1, :], w1_ref[c],
                              preferred_element_type=jnp.float32)  # (1, hidden)
        h1 = jnp.maximum(h1, 0.0)
        out_ref[n:n + 1, :] = (
            jnp.dot(h1, w2, preferred_element_type=jnp.float32) + b2)


# ----------------------------------------------------------------------------
# Wrapper: layout plumbing only (transposes / reshapes of inputs & parameters).
# ----------------------------------------------------------------------------
def combined_model_forward(x_nchw, params):
    """x_nchw: (N, Cin, H, W) float32 -> (N, out_dim) float32."""
    N, Cin, H, W = x_nchw.shape
    conv_w = params["conv_w"]          # (3, 3, Cin, Cout)  HWIO
    conv_b = params["conv_b"]          # (Cout,)
    fc1_w = params["fc1_w"]            # (Cout*36, hidden)  (in, out)
    fc1_b = params["fc1_b"]            # (hidden,)
    fc2_w = params["fc2_w"]            # (hidden, out_dim)  (in, out)
    fc2_b = params["fc2_b"]            # (out_dim,)
    Cout = conv_w.shape[-1]
    hidden = fc1_w.shape[-1]
    out_dim = fc2_w.shape[-1]
    HW, NHW = H * W, N * H * W
    assert fc1_w.shape[0] == Cout * 36

    # Channel-major, spatially flattened input: x_lanes[cin, n*H*W + h*W + w].
    x_lanes = jnp.transpose(x_nchw, (1, 0, 2, 3)).reshape(Cin, NHW).astype(jnp.float32)

    # Conv weight as (9, Cout, Cin): tap index kh*3+kw leading so the kernel can
    # index it without unaligned lane slicing.
    wc_stack = jnp.transpose(conv_w.astype(jnp.float32).reshape(9, Cin, Cout),
                             (0, 2, 1))                               # (9, Cout, Cin)
    bc = conv_b.reshape(Cout, 1).astype(jnp.float32)

    shifts, masks = _conv3x3_shift_masks(N, H, W)                     # tuple, (9,1,NHW)
    pool_m = jnp.asarray(_adaptive_pool_matrix_2d(H, W, 6, 6))        # (H*W, 36)

    # fc1 weight grouped per conv channel so the NCHW flatten is a leading-dim index.
    w1r = fc1_w.astype(jnp.float32).reshape(Cout, 36, hidden)
    b1 = fc1_b.reshape(1, hidden).astype(jnp.float32)
    w2 = fc2_w.astype(jnp.float32)
    b2 = fc2_b.reshape(1, out_dim).astype(jnp.float32)

    kernel = functools.partial(_fused_forward_kernel, shifts=shifts,
                               n_batch=N, hw=HW, cout=Cout)

    return pl.pallas_call(
        kernel,
        out_shape=jax.ShapeDtypeStruct((N, out_dim), jnp.float32),
        in_specs=[pl.BlockSpec(memory_space=pltpu.MemorySpace.VMEM)
                  for _ in range(9)],
        out_specs=pl.BlockSpec(memory_space=pltpu.MemorySpace.VMEM),
    )(x_lanes, wc_stack, bc, jnp.asarray(masks), pool_m, w1r, b1, w2, b2)


def init_params(key, cin=4, cout=8, hidden=32, out_dim=7):
    ks = jax.random.split(key, 6)
    scale = 0.1
    return {
        "conv_w": scale * jax.random.normal(ks[0], (3, 3, cin, cout), jnp.float32),
        "conv_b": scale * jax.random.normal(ks[1], (cout,), jnp.float32),
        "fc1_w": scale * jax.random.normal(ks[2], (cout * 36, hidden), jnp.float32),
        "fc1_b": scale * jax.random.normal(ks[3], (hidden,), jnp.float32),
        "fc2_w": scale * jax.random.normal(ks[4], (hidden, out_dim), jnp.float32),
        "fc2_b": scale * jax.random.normal(ks[5], (out_dim,), jnp.float32),
    }


if __name__ == "__main__":
    key = jax.random.PRNGKey(0)
    k_x, k_p = jax.random.split(key)
    N, Cin, H, W = 2, 4, 16, 16
    x = jax.random.normal(k_x, (N, Cin, H, W), jnp.float32)   # NCHW, like PyTorch
    params = init_params(k_p, cin=Cin)

    out = jax.jit(combined_model_forward)(x, params)
    out = jax.block_until_ready(out)
    assert out.shape == (N, 7) and out.dtype == jnp.float32
    assert bool(jnp.all(jnp.isfinite(out)))
    print("KERNEL_OK")
</pallas_src>

<mosaic_0001>
module attributes {stable_mosaic.version = 11 : i64} {
  func.func @_fused_forward_kernel(%arg0: memref<4x512xf32, #tpu.memory_space<vmem>>, %arg1: memref<9x8x4xf32, #tpu.memory_space<vmem>>, %arg2: memref<8x1xf32, #tpu.memory_space<vmem>>, %arg3: memref<9x1x512xf32, #tpu.memory_space<vmem>>, %arg4: memref<256x36xf32, #tpu.memory_space<vmem>>, %arg5: memref<8x36x32xf32, #tpu.memory_space<vmem>>, %arg6: memref<1x32xf32, #tpu.memory_space<vmem>>, %arg7: memref<32x7xf32, #tpu.memory_space<vmem>>, %arg8: memref<1x7xf32, #tpu.memory_space<vmem>>, %arg9: memref<2x7xf32, #tpu.memory_space<vmem>>) attributes {dimension_semantics = [], scalar_prefetch = 0 : i64, scratch_operands = 0 : i64, tpu.core_type = #tpu.core_type<tc>} {
    %c0 = arith.constant 0 : index
    %c0_0 = arith.constant 0 : index
    %0 = vector.load %arg0[%c0, %c0_0] : memref<4x512xf32, #tpu.memory_space<vmem>>, vector<4x512xf32>
    %cst = arith.constant 0.000000e+00 : f32
    %1 = vector.broadcast %cst : f32 to vector<8x512xf32>
    %c17_i32 = arith.constant 17 : i32
    %2 = tpu.dynamic_rotate %0 by %c17_i32 dim 1 : vector<4x512xf32>, i32 -> vector<4x512xf32>
    %c0_1 = arith.constant 0 : index
    %c0_2 = arith.constant 0 : index
    %c0_3 = arith.constant 0 : index
    %3 = vector.load %arg3[%c0_1, %c0_2, %c0_3] : memref<9x1x512xf32, #tpu.memory_space<vmem>>, vector<1x1x512xf32>
    %4 = vector.shape_cast %3 : vector<1x1x512xf32> to vector<1x512xf32>
    %5 = vector.broadcast %4 : vector<1x512xf32> to vector<4x512xf32>
    %6 = arith.mulf %2, %5 : vector<4x512xf32>
    %c0_4 = arith.constant 0 : index
    %c0_5 = arith.constant 0 : index
    %c0_6 = arith.constant 0 : index
    %7 = vector.load %arg1[%c0_4, %c0_5, %c0_6] : memref<9x8x4xf32, #tpu.memory_space<vmem>>, vector<1x8x4xf32>
    %8 = vector.shape_cast %7 : vector<1x8x4xf32> to vector<8x4xf32>
    %cst_7 = arith.constant dense<0.000000e+00> : vector<8x512xf32>
    %9 = tpu.matmul %8, %6, %cst_7 {dimension_numbers = #tpu.dot_dimension_numbers<[1], [0], [0], [1], [0, 0, 1, 1], [], []>} : vector<8x4xf32>, vector<4x512xf32>, vector<8x512xf32> -> vector<8x512xf32>
    %10 = arith.addf %1, %9 : vector<8x512xf32>
    %c16_i32 = arith.constant 16 : i32
    %11 = tpu.dynamic_rotate %0 by %c16_i32 dim 1 : vector<4x512xf32>, i32 -> vector<4x512xf32>
    %c1 = arith.constant 1 : index
    %c0_8 = arith.constant 0 : index
    %c0_9 = arith.constant 0 : index
    %12 = vector.load %arg3[%c1, %c0_8, %c0_9] : memref<9x1x512xf32, #tpu.memory_space<vmem>>, vector<1x1x512xf32>
    %13 = vector.shape_cast %12 : vector<1x1x512xf32> to vector<1x512xf32>
    %14 = vector.broadcast %13 : vector<1x512xf32> to vector<4x512xf32>
    %15 = arith.mulf %11, %14 : vector<4x512xf32>
    %c1_10 = arith.constant 1 : index
    %c0_11 = arith.constant 0 : index
    %c0_12 = arith.constant 0 : index
    %16 = vector.load %arg1[%c1_10, %c0_11, %c0_12] : memref<9x8x4xf32, #tpu.memory_space<vmem>>, vector<1x8x4xf32>
    %17 = vector.shape_cast %16 : vector<1x8x4xf32> to vector<8x4xf32>
    %cst_13 = arith.constant dense<0.000000e+00> : vector<8x512xf32>
    %18 = tpu.matmul %17, %15, %cst_13 {dimension_numbers = #tpu.dot_dimension_numbers<[1], [0], [0], [1], [0, 0, 1, 1], [], []>} : vector<8x4xf32>, vector<4x512xf32>, vector<8x512xf32> -> vector<8x512xf32>
    %19 = arith.addf %10, %18 : vector<8x512xf32>
    %c15_i32 = arith.constant 15 : i32
    %20 = tpu.dynamic_rotate %0 by %c15_i32 dim 1 : vector<4x512xf32>, i32 -> vector<4x512xf32>
    %c2 = arith.constant 2 : index
    %c0_14 = arith.constant 0 : index
    %c0_15 = arith.constant 0 : index
    %21 = vector.load %arg3[%c2, %c0_14, %c0_15] : memref<9x1x512xf32, #tpu.memory_space<vmem>>, vector<1x1x512xf32>
    %22 = vector.shape_cast %21 : vector<1x1x512xf32> to vector<1x512xf32>
    %23 = vector.broadcast %22 : vector<1x512xf32> to vector<4x512xf32>
    %24 = arith.mulf %20, %23 : vector<4x512xf32>
    %c2_16 = arith.constant 2 : index
    %c0_17 = arith.constant 0 : index
    %c0_18 = arith.constant 0 : index
    %25 = vector.load %arg1[%c2_16, %c0_17, %c0_18] : memref<9x8x4xf32, #tpu.memory_space<vmem>>, vector<1x8x4xf32>
    %26 = vector.shape_cast %25 : vector<1x8x4xf32> to vector<8x4xf32>
    %cst_19 = arith.constant dense<0.000000e+00> : vector<8x512xf32>
    %27 = tpu.matmul %26, %24, %cst_19 {dimension_numbers = #tpu.dot_dimension_numbers<[1], [0], [0], [1], [0, 0, 1, 1], [], []>} : vector<8x4xf32>, vector<4x512xf32>, vector<8x512xf32> -> vector<8x512xf32>
    %28 = arith.addf %19, %27 : vector<8x512xf32>
    %c1_i32 = arith.constant 1 : i32
    %29 = tpu.dynamic_rotate %0 by %c1_i32 dim 1 : vector<4x512xf32>, i32 -> vector<4x512xf32>
    %c3 = arith.constant 3 : index
    %c0_20 = arith.constant 0 : index
    %c0_21 = arith.constant 0 : index
    %30 = vector.load %arg3[%c3, %c0_20, %c0_21] : memref<9x1x512xf32, #tpu.memory_space<vmem>>, vector<1x1x512xf32>
    %31 = vector.shape_cast %30 : vector<1x1x512xf32> to vector<1x512xf32>
    %32 = vector.broadcast %31 : vector<1x512xf32> to vector<4x512xf32>
    %33 = arith.mulf %29, %32 : vector<4x512xf32>
    %c3_22 = arith.constant 3 : index
    %c0_23 = arith.constant 0 : index
    %c0_24 = arith.constant 0 : index
    %34 = vector.load %arg1[%c3_22, %c0_23, %c0_24] : memref<9x8x4xf32, #tpu.memory_space<vmem>>, vector<1x8x4xf32>
    %35 = vector.shape_cast %34 : vector<1x8x4xf32> to vector<8x4xf32>
    %cst_25 = arith.constant dense<0.000000e+00> : vector<8x512xf32>
    %36 = tpu.matmul %35, %33, %cst_25 {dimension_numbers = #tpu.dot_dimension_numbers<[1], [0], [0], [1], [0, 0, 1, 1], [], []>} : vector<8x4xf32>, vector<4x512xf32>, vector<8x512xf32> -> vector<8x512xf32>
    %37 = arith.addf %28, %36 : vector<8x512xf32>
    %c4 = arith.constant 4 : index
    %c0_26 = arith.constant 0 : index
    %c0_27 = arith.constant 0 : index
    %38 = vector.load %arg3[%c4, %c0_26, %c0_27] : memref<9x1x512xf32, #tpu.memory_space<vmem>>, vector<1x1x512xf32>
    %39 = vector.shape_cast %38 : vector<1x1x512xf32> to vector<1x512xf32>
    %40 = vector.broadcast %39 : vector<1x512xf32> to vector<4x512xf32>
    %41 = arith.mulf %0, %40 : vector<4x512xf32>
    %c4_28 = arith.constant 4 : index
    %c0_29 = arith.constant 0 : index
    %c0_30 = arith.constant 0 : index
    %42 = vector.load %arg1[%c4_28, %c0_29, %c0_30] : memref<9x8x4xf32, #tpu.memory_space<vmem>>, vector<1x8x4xf32>
    %43 = vector.shape_cast %42 : vector<1x8x4xf32> to vector<8x4xf32>
    %cst_31 = arith.constant dense<0.000000e+00> : vector<8x512xf32>
    %44 = tpu.matmul %43, %41, %cst_31 {dimension_numbers = #tpu.dot_dimension_numbers<[1], [0], [0], [1], [0, 0, 1, 1], [], []>} : vector<8x4xf32>, vector<4x512xf32>, vector<8x512xf32> -> vector<8x512xf32>
    %45 = arith.addf %37, %44 : vector<8x512xf32>
    %c511_i32 = arith.constant 511 : i32
    %46 = tpu.dynamic_rotate %0 by %c511_i32 dim 1 : vector<4x512xf32>, i32 -> vector<4x512xf32>
    %c5 = arith.constant 5 : index
    %c0_32 = arith.constant 0 : index
    %c0_33 = arith.constant 0 : index
    %47 = vector.load %arg3[%c5, %c0_32, %c0_33] : memref<9x1x512xf32, #tpu.memory_space<vmem>>, vector<1x1x512xf32>
    %48 = vector.shape_cast %47 : vector<1x1x512xf32> to vector<1x512xf32>
    %49 = vector.broadcast %48 : vector<1x512xf32> to vector<4x512xf32>
    %50 = arith.mulf %46, %49 : vector<4x512xf32>
    %c5_34 = arith.constant 5 : index
    %c0_35 = arith.constant 0 : index
    %c0_36 = arith.constant 0 : index
    %51 = vector.load %arg1[%c5_34, %c0_35, %c0_36] : memref<9x8x4xf32, #tpu.memory_space<vmem>>, vector<1x8x4xf32>
    %52 = vector.shape_cast %51 : vector<1x8x4xf32> to vector<8x4xf32>
    %cst_37 = arith.constant dense<0.000000e+00> : vector<8x512xf32>
    %53 = tpu.matmul %52, %50, %cst_37 {dimension_numbers = #tpu.dot_dimension_numbers<[1], [0], [0], [1], [0, 0, 1, 1], [], []>} : vector<8x4xf32>, vector<4x512xf32>, vector<8x512xf32> -> vector<8x512xf32>
    %54 = arith.addf %45, %53 : vector<8x512xf32>
    %c497_i32 = arith.constant 497 : i32
    %55 = tpu.dynamic_rotate %0 by %c497_i32 dim 1 : vector<4x512xf32>, i32 -> vector<4x512xf32>
    %c6 = arith.constant 6 : index
    %c0_38 = arith.constant 0 : index
    %c0_39 = arith.constant 0 : index
    %56 = vector.load %arg3[%c6, %c0_38, %c0_39] : memref<9x1x512xf32, #tpu.memory_space<vmem>>, vector<1x1x512xf32>
    %57 = vector.shape_cast %56 : vector<1x1x512xf32> to vector<1x512xf32>
    %58 = vector.broadcast %57 : vector<1x512xf32> to vector<4x512xf32>
    %59 = arith.mulf %55, %58 : vector<4x512xf32>
    %c6_40 = arith.constant 6 : index
    %c0_41 = arith.constant 0 : index
    %c0_42 = arith.constant 0 : index
    %60 = vector.load %arg1[%c6_40, %c0_41, %c0_42] : memref<9x8x4xf32, #tpu.memory_space<vmem>>, vector<1x8x4xf32>
    %61 = vector.shape_cast %60 : vector<1x8x4xf32> to vector<8x4xf32>
    %cst_43 = arith.constant dense<0.000000e+00> : vector<8x512xf32>
    %62 = tpu.matmul %61, %59, %cst_43 {dimension_numbers = #tpu.dot_dimension_numbers<[1], [0], [0], [1], [0, 0, 1, 1], [], []>} : vector<8x4xf32>, vector<4x512xf32>, vector<8x512xf32> -> vector<8x512xf32>
    %63 = arith.addf %54, %62 : vector<8x512xf32>
    %c496_i32 = arith.constant 496 : i32
    %64 = tpu.dynamic_rotate %0 by %c496_i32 dim 1 : vector<4x512xf32>, i32 -> vector<4x512xf32>
    %c7 = arith.constant 7 : index
    %c0_44 = arith.constant 0 : index
    %c0_45 = arith.constant 0 : index
    %65 = vector.load %arg3[%c7, %c0_44, %c0_45] : memref<9x1x512xf32, #tpu.memory_space<vmem>>, vector<1x1x512xf32>
    %66 = vector.shape_cast %65 : vector<1x1x512xf32> to vector<1x512xf32>
    %67 = vector.broadcast %66 : vector<1x512xf32> to vector<4x512xf32>
    %68 = arith.mulf %64, %67 : vector<4x512xf32>
    %c7_46 = arith.constant 7 : index
    %c0_47 = arith.constant 0 : index
    %c0_48 = arith.constant 0 : index
    %69 = vector.load %arg1[%c7_46, %c0_47, %c0_48] : memref<9x8x4xf32, #tpu.memory_space<vmem>>, vector<1x8x4xf32>
    %70 = vector.shape_cast %69 : vector<1x8x4xf32> to vector<8x4xf32>
    %cst_49 = arith.constant dense<0.000000e+00> : vector<8x512xf32>
    %71 = tpu.matmul %70, %68, %cst_49 {dimension_numbers = #tpu.dot_dimension_numbers<[1], [0], [0], [1], [0, 0, 1, 1], [], []>} : vector<8x4xf32>, vector<4x512xf32>, vector<8x512xf32> -> vector<8x512xf32>
    %72 = arith.addf %63, %71 : vector<8x512xf32>
    %c495_i32 = arith.constant 495 : i32
    %73 = tpu.dynamic_rotate %0 by %c495_i32 dim 1 : vector<4x512xf32>, i32 -> vector<4x512xf32>
    %c8 = arith.constant 8 : index
    %c0_50 = arith.constant 0 : index
    %c0_51 = arith.constant 0 : index
    %74 = vector.load %arg3[%c8, %c0_50, %c0_51] : memref<9x1x512xf32, #tpu.memory_space<vmem>>, vector<1x1x512xf32>
    %75 = vector.shape_cast %74 : vector<1x1x512xf32> to vector<1x512xf32>
    %76 = vector.broadcast %75 : vector<1x512xf32> to vector<4x512xf32>
    %77 = arith.mulf %73, %76 : vector<4x512xf32>
    %c8_52 = arith.constant 8 : index
    %c0_53 = arith.constant 0 : index
    %c0_54 = arith.constant 0 : index
    %78 = vector.load %arg1[%c8_52, %c0_53, %c0_54] : memref<9x8x4xf32, #tpu.memory_space<vmem>>, vector<1x8x4xf32>
    %79 = vector.shape_cast %78 : vector<1x8x4xf32> to vector<8x4xf32>
    %cst_55 = arith.constant dense<0.000000e+00> : vector<8x512xf32>
    %80 = tpu.matmul %79, %77, %cst_55 {dimension_numbers = #tpu.dot_dimension_numbers<[1], [0], [0], [1], [0, 0, 1, 1], [], []>} : vector<8x4xf32>, vector<4x512xf32>, vector<8x512xf32> -> vector<8x512xf32>
    %81 = arith.addf %72, %80 : vector<8x512xf32>
    %c0_56 = arith.constant 0 : index
    %c0_57 = arith.constant 0 : index
    %82 = vector.load %arg2[%c0_56, %c0_57] : memref<8x1xf32, #tpu.memory_space<vmem>>, vector<8x1xf32>
    %83 = vector.broadcast %82 : vector<8x1xf32> to vector<8x512xf32>
    %84 = arith.addf %81, %83 : vector<8x512xf32>
    %cst_58 = arith.constant 0.000000e+00 : f32
    %85 = vector.broadcast %cst_58 : f32 to vector<8x512xf32>
    %86 = arith.maximumf %84, %85 : vector<8x512xf32>
    %c0_59 = arith.constant 0 : index
    %c0_60 = arith.constant 0 : index
    %87 = vector.load %arg4[%c0_59, %c0_60] : memref<256x36xf32, #tpu.memory_space<vmem>>, vector<256x36xf32>
    %c0_61 = arith.constant 0 : index
    %c0_62 = arith.constant 0 : index
    %88 = vector.load %arg6[%c0_61, %c0_62] : memref<1x32xf32, #tpu.memory_space<vmem>>, vector<1x32xf32>
    %c0_63 = arith.constant 0 : index
    %c0_64 = arith.constant 0 : index
    %89 = vector.load %arg7[%c0_63, %c0_64] : memref<32x7xf32, #tpu.memory_space<vmem>>, vector<32x7xf32>
    %c0_65 = arith.constant 0 : index
    %c0_66 = arith.constant 0 : index
    %90 = vector.load %arg8[%c0_65, %c0_66] : memref<1x7xf32, #tpu.memory_space<vmem>>, vector<1x7xf32>
    %91 = vector.extract_strided_slice %86 {offsets = [0, 0], sizes = [8, 256], strides = [1, 1]} : vector<8x512xf32> to vector<8x256xf32>
    %cst_67 = arith.constant dense<0.000000e+00> : vector<8x36xf32>
    %92 = tpu.matmul %91, %87, %cst_67 {dimension_numbers = #tpu.dot_dimension_numbers<[1], [0], [0], [1], [0, 0, 1, 1], [], []>} : vector<8x256xf32>, vector<256x36xf32>, vector<8x36xf32> -> vector<8x36xf32>
    %93 = vector.extract_strided_slice %92 {offsets = [0, 0], sizes = [1, 36], strides = [1, 1]} : vector<8x36xf32> to vector<1x36xf32>
    %c0_68 = arith.constant 0 : index
    %c0_69 = arith.constant 0 : index
    %c0_70 = arith.constant 0 : index
    %94 = vector.load %arg5[%c0_68, %c0_69, %c0_70] : memref<8x36x32xf32, #tpu.memory_space<vmem>>, vector<1x36x32xf32>
    %95 = vector.shape_cast %94 : vector<1x36x32xf32> to vector<36x32xf32>
    %cst_71 = arith.constant dense<0.000000e+00> : vector<1x32xf32>
    %96 = tpu.matmul %93, %95, %cst_71 {dimension_numbers = #tpu.dot_dimension_numbers<[1], [0], [0], [1], [0, 0, 1, 1], [], []>} : vector<1x36xf32>, vector<36x32xf32>, vector<1x32xf32> -> vector<1x32xf32>
    %97 = arith.addf %88, %96 : vector<1x32xf32>
    %98 = vector.extract_strided_slice %92 {offsets = [1, 0], sizes = [1, 36], strides = [1, 1]} : vector<8x36xf32> to vector<1x36xf32>
    %c1_72 = arith.constant 1 : index
    %c0_73 = arith.constant 0 : index
    %c0_74 = arith.constant 0 : index
    %99 = vector.load %arg5[%c1_72, %c0_73, %c0_74] : memref<8x36x32xf32, #tpu.memory_space<vmem>>, vector<1x36x32xf32>
    %100 = vector.shape_cast %99 : vector<1x36x32xf32> to vector<36x32xf32>
    %cst_75 = arith.constant dense<0.000000e+00> : vector<1x32xf32>
    %101 = tpu.matmul %98, %100, %cst_75 {dimension_numbers = #tpu.dot_dimension_numbers<[1], [0], [0], [1], [0, 0, 1, 1], [], []>} : vector<1x36xf32>, vector<36x32xf32>, vector<1x32xf32> -> vector<1x32xf32>
    %102 = arith.addf %97, %101 : vector<1x32xf32>
    %103 = vector.extract_strided_slice %92 {offsets = [2, 0], sizes = [1, 36], strides = [1, 1]} : vector<8x36xf32> to vector<1x36xf32>
    %c2_76 = arith.constant 2 : index
    %c0_77 = arith.constant 0 : index
    %c0_78 = arith.constant 0 : index
    %104 = vector.load %arg5[%c2_76, %c0_77, %c0_78] : memref<8x36x32xf32, #tpu.memory_space<vmem>>, vector<1x36x32xf32>
    %105 = vector.shape_cast %104 : vector<1x36x32xf32> to vector<36x32xf32>
    %cst_79 = arith.constant dense<0.000000e+00> : vector<1x32xf32>
    %106 = tpu.matmul %103, %105, %cst_79 {dimension_numbers = #tpu.dot_dimension_numbers<[1], [0], [0], [1], [0, 0, 1, 1], [], []>} : vector<1x36xf32>, vector<36x32xf32>, vector<1x32xf32> -> vector<1x32xf32>
    %107 = arith.addf %102, %106 : vector<1x32xf32>
    %108 = vector.extract_strided_slice %92 {offsets = [3, 0], sizes = [1, 36], strides = [1, 1]} : vector<8x36xf32> to vector<1x36xf32>
    %c3_80 = arith.constant 3 : index
    %c0_81 = arith.constant 0 : index
    %c0_82 = arith.constant 0 : index
    %109 = vector.load %arg5[%c3_80, %c0_81, %c0_82] : memref<8x36x32xf32, #tpu.memory_space<vmem>>, vector<1x36x32xf32>
    %110 = vector.shape_cast %109 : vector<1x36x32xf32> to vector<36x32xf32>
    %cst_83 = arith.constant dense<0.000000e+00> : vector<1x32xf32>
    %111 = tpu.matmul %108, %110, %cst_83 {dimension_numbers = #tpu.dot_dimension_numbers<[1], [0], [0], [1], [0, 0, 1, 1], [], []>} : vector<1x36xf32>, vector<36x32xf32>, vector<1x32xf32> -> vector<1x32xf32>
    %112 = arith.addf %107, %111 : vector<1x32xf32>
    %113 = vector.extract_strided_slice %92 {offsets = [4, 0], sizes = [1, 36], strides = [1, 1]} : vector<8x36xf32> to vector<1x36xf32>
    %c4_84 = arith.constant 4 : index
    %c0_85 = arith.constant 0 : index
    %c0_86 = arith.constant 0 : index
    %114 = vector.load %arg5[%c4_84, %c0_85, %c0_86] : memref<8x36x32xf32, #tpu.memory_space<vmem>>, vector<1x36x32xf32>
    %115 = vector.shape_cast %114 : vector<1x36x32xf32> to vector<36x32xf32>
    %cst_87 = arith.constant dense<0.000000e+00> : vector<1x32xf32>
    %116 = tpu.matmul %113, %115, %cst_87 {dimension_numbers = #tpu.dot_dimension_numbers<[1], [0], [0], [1], [0, 0, 1, 1], [], []>} : vector<1x36xf32>, vector<36x32xf32>, vector<1x32xf32> -> vector<1x32xf32>
    %117 = arith.addf %112, %116 : vector<1x32xf32>
    %118 = vector.extract_strided_slice %92 {offsets = [5, 0], sizes = [1, 36], strides = [1, 1]} : vector<8x36xf32> to vector<1x36xf32>
    %c5_88 = arith.constant 5 : index
    %c0_89 = arith.constant 0 : index
    %c0_90 = arith.constant 0 : index
    %119 = vector.load %arg5[%c5_88, %c0_89, %c0_90] : memref<8x36x32xf32, #tpu.memory_space<vmem>>, vector<1x36x32xf32>
    %120 = vector.shape_cast %119 : vector<1x36x32xf32> to vector<36x32xf32>
    %cst_91 = arith.constant dense<0.000000e+00> : vector<1x32xf32>
    %121 = tpu.matmul %118, %120, %cst_91 {dimension_numbers = #tpu.dot_dimension_numbers<[1], [0], [0], [1], [0, 0, 1, 1], [], []>} : vector<1x36xf32>, vector<36x32xf32>, vector<1x32xf32> -> vector<1x32xf32>
    %122 = arith.addf %117, %121 : vector<1x32xf32>
    %123 = vector.extract_strided_slice %92 {offsets = [6, 0], sizes = [1, 36], strides = [1, 1]} : vector<8x36xf32> to vector<1x36xf32>
    %c6_92 = arith.constant 6 : index
    %c0_93 = arith.constant 0 : index
    %c0_94 = arith.constant 0 : index
    %124 = vector.load %arg5[%c6_92, %c0_93, %c0_94] : memref<8x36x32xf32, #tpu.memory_space<vmem>>, vector<1x36x32xf32>
    %125 = vector.shape_cast %124 : vector<1x36x32xf32> to vector<36x32xf32>
    %cst_95 = arith.constant dense<0.000000e+00> : vector<1x32xf32>
    %126 = tpu.matmul %123, %125, %cst_95 {dimension_numbers = #tpu.dot_dimension_numbers<[1], [0], [0], [1], [0, 0, 1, 1], [], []>} : vector<1x36xf32>, vector<36x32xf32>, vector<1x32xf32> -> vector<1x32xf32>
    %127 = arith.addf %122, %126 : vector<1x32xf32>
    %128 = vector.extract_strided_slice %92 {offsets = [7, 0], sizes = [1, 36], strides = [1, 1]} : vector<8x36xf32> to vector<1x36xf32>
    %c7_96 = arith.constant 7 : index
    %c0_97 = arith.constant 0 : index
    %c0_98 = arith.constant 0 : index
    %129 = vector.load %arg5[%c7_96, %c0_97, %c0_98] : memref<8x36x32xf32, #tpu.memory_space<vmem>>, vector<1x36x32xf32>
    %130 = vector.shape_cast %129 : vector<1x36x32xf32> to vector<36x32xf32>
    %cst_99 = arith.constant dense<0.000000e+00> : vector<1x32xf32>
    %131 = tpu.matmul %128, %130, %cst_99 {dimension_numbers = #tpu.dot_dimension_numbers<[1], [0], [0], [1], [0, 0, 1, 1], [], []>} : vector<1x36xf32>, vector<36x32xf32>, vector<1x32xf32> -> vector<1x32xf32>
    %132 = arith.addf %127, %131 : vector<1x32xf32>
    %cst_100 = arith.constant 0.000000e+00 : f32
    %133 = vector.broadcast %cst_100 : f32 to vector<1x32xf32>
    %134 = arith.maximumf %132, %133 : vector<1x32xf32>
    %cst_101 = arith.constant dense<0.000000e+00> : vector<1x7xf32>
    %135 = tpu.matmul %134, %89, %cst_101 {dimension_numbers = #tpu.dot_dimension_numbers<[1], [0], [0], [1], [0, 0, 1, 1], [], []>} : vector<1x32xf32>, vector<32x7xf32>, vector<1x7xf32> -> vector<1x7xf32>
    %136 = arith.addf %135, %90 : vector<1x7xf32>
    %c0_102 = arith.constant 0 : index
    %c0_103 = arith.constant 0 : index
    %137 = vector.load %arg9[%c0_102, %c0_103] : memref<2x7xf32, #tpu.memory_space<vmem>>, vector<1x7xf32>
    tpu.vector_store %arg9[%c0_102, %c0_103], %136 {strides = array<i32>} : memref<2x7xf32, #tpu.memory_space<vmem>>, vector<1x7xf32>,
    %138 = vector.extract_strided_slice %86 {offsets = [0, 256], sizes = [8, 256], strides = [1, 1]} : vector<8x512xf32> to vector<8x256xf32>
    %cst_104 = arith.constant dense<0.000000e+00> : vector<8x36xf32>
    %139 = tpu.matmul %138, %87, %cst_104 {dimension_numbers = #tpu.dot_dimension_numbers<[1], [0], [0], [1], [0, 0, 1, 1], [], []>} : vector<8x256xf32>, vector<256x36xf32>, vector<8x36xf32> -> vector<8x36xf32>
    %140 = vector.extract_strided_slice %139 {offsets = [0, 0], sizes = [1, 36], strides = [1, 1]} : vector<8x36xf32> to vector<1x36xf32>
    %c0_105 = arith.constant 0 : index
    %c0_106 = arith.constant 0 : index
    %c0_107 = arith.constant 0 : index
    %141 = vector.load %arg5[%c0_105, %c0_106, %c0_107] : memref<8x36x32xf32, #tpu.memory_space<vmem>>, vector<1x36x32xf32>
    %142 = vector.shape_cast %141 : vector<1x36x32xf32> to vector<36x32xf32>
    %cst_108 = arith.constant dense<0.000000e+00> : vector<1x32xf32>
    %143 = tpu.matmul %140, %142, %cst_108 {dimension_numbers = #tpu.dot_dimension_numbers<[1], [0], [0], [1], [0, 0, 1, 1], [], []>} : vector<1x36xf32>, vector<36x32xf32>, vector<1x32xf32> -> vector<1x32xf32>
    %144 = arith.addf %88, %143 : vector<1x32xf32>
    %145 = vector.extract_strided_slice %139 {offsets = [1, 0], sizes = [1, 36], strides = [1, 1]} : vector<8x36xf32> to vector<1x36xf32>
    %c1_109 = arith.constant 1 : index
    %c0_110 = arith.constant 0 : index
    %c0_111 = arith.constant 0 : index
    %146 = vector.load %arg5[%c1_109, %c0_110, %c0_111] : memref<8x36x32xf32, #tpu.memory_space<vmem>>, vector<1x36x32xf32>
    %147 = vector.shape_cast %146 : vector<1x36x32xf32> to vector<36x32xf32>
    %cst_112 = arith.constant dense<0.000000e+00> : vector<1x32xf32>
    %148 = tpu.matmul %145, %147, %cst_112 {dimension_numbers = #tpu.dot_dimension_numbers<[1], [0], [0], [1], [0, 0, 1, 1], [], []>} : vector<1x36xf32>, vector<36x32xf32>, vector<1x32xf32> -> vector<1x32xf32>
    %149 = arith.addf %144, %148 : vector<1x32xf32>
    %150 = vector.extract_strided_slice %139 {offsets = [2, 0], sizes = [1, 36], strides = [1, 1]} : vector<8x36xf32> to vector<1x36xf32>
    %c2_113 = arith.constant 2 : index
    %c0_114 = arith.constant 0 : index
    %c0_115 = arith.constant 0 : index
    %151 = vector.load %arg5[%c2_113, %c0_114, %c0_115] : memref<8x36x32xf32, #tpu.memory_space<vmem>>, vector<1x36x32xf32>
    %152 = vector.shape_cast %151 : vector<1x36x32xf32> to vector<36x32xf32>
    %cst_116 = arith.constant dense<0.000000e+00> : vector<1x32xf32>
    %153 = tpu.matmul %150, %152, %cst_116 {dimension_numbers = #tpu.dot_dimension_numbers<[1], [0], [0], [1], [0, 0, 1, 1], [], []>} : vector<1x36xf32>, vector<36x32xf32>, vector<1x32xf32> -> vector<1x32xf32>
    %154 = arith.addf %149, %153 : vector<1x32xf32>
    %155 = vector.extract_strided_slice %139 {offsets = [3, 0], sizes = [1, 36], strides = [1, 1]} : vector<8x36xf32> to vector<1x36xf32>
    %c3_117 = arith.constant 3 : index
    %c0_118 = arith.constant 0 : index
    %c0_119 = arith.constant 0 : index
    %156 = vector.load %arg5[%c3_117, %c0_118, %c0_119] : memref<8x36x32xf32, #tpu.memory_space<vmem>>, vector<1x36x32xf32>
    %157 = vector.shape_cast %156 : vector<1x36x32xf32> to vector<36x32xf32>
    %cst_120 = arith.constant dense<0.000000e+00> : vector<1x32xf32>
    %158 = tpu.matmul %155, %157, %cst_120 {dimension_numbers = #tpu.dot_dimension_numbers<[1], [0], [0], [1], [0, 0, 1, 1], [], []>} : vector<1x36xf32>, vector<36x32xf32>, vector<1x32xf32> -> vector<1x32xf32>
    %159 = arith.addf %154, %158 : vector<1x32xf32>
    %160 = vector.extract_strided_slice %139 {offsets = [4, 0], sizes = [1, 36], strides = [1, 1]} : vector<8x36xf32> to vector<1x36xf32>
    %c4_121 = arith.constant 4 : index
    %c0_122 = arith.constant 0 : index
    %c0_123 = arith.constant 0 : index
    %161 = vector.load %arg5[%c4_121, %c0_122, %c0_123] : memref<8x36x32xf32, #tpu.memory_space<vmem>>, vector<1x36x32xf32>
    %162 = vector.shape_cast %161 : vector<1x36x32xf32> to vector<36x32xf32>
    %cst_124 = arith.constant dense<0.000000e+00> : vector<1x32xf32>
    %163 = tpu.matmul %160, %162, %cst_124 {dimension_numbers = #tpu.dot_dimension_numbers<[1], [0], [0], [1], [0, 0, 1, 1], [], []>} : vector<1x36xf32>, vector<36x32xf32>, vector<1x32xf32> -> vector<1x32xf32>
    %164 = arith.addf %159, %163 : vector<1x32xf32>
    %165 = vector.extract_strided_slice %139 {offsets = [5, 0], sizes = [1, 36], strides = [1, 1]} : vector<8x36xf32> to vector<1x36xf32>
    %c5_125 = arith.constant 5 : index
    %c0_126 = arith.constant 0 : index
    %c0_127 = arith.constant 0 : index
    %166 = vector.load %arg5[%c5_125, %c0_126, %c0_127] : memref<8x36x32xf32, #tpu.memory_space<vmem>>, vector<1x36x32xf32>
    %167 = vector.shape_cast %166 : vector<1x36x32xf32> to vector<36x32xf32>
    %cst_128 = arith.constant dense<0.000000e+00> : vector<1x32xf32>
    %168 = tpu.matmul %165, %167, %cst_128 {dimension_numbers = #tpu.dot_dimension_numbers<[1], [0], [0], [1], [0, 0, 1, 1], [], []>} : vector<1x36xf32>, vector<36x32xf32>, vector<1x32xf32> -> vector<1x32xf32>
    %169 = arith.addf %164, %168 : vector<1x32xf32>
    %170 = vector.extract_strided_slice %139 {offsets = [6, 0], sizes = [1, 36], strides = [1, 1]} : vector<8x36xf32> to vector<1x36xf32>
    %c6_129 = arith.constant 6 : index
    %c0_130 = arith.constant 0 : index
    %c0_131 = arith.constant 0 : index
    %171 = vector.load %arg5[%c6_129, %c0_130, %c0_131] : memref<8x36x32xf32, #tpu.memory_space<vmem>>, vector<1x36x32xf32>
    %172 = vector.shape_cast %171 : vector<1x36x32xf32> to vector<36x32xf32>
    %cst_132 = arith.constant dense<0.000000e+00> : vector<1x32xf32>
    %173 = tpu.matmul %170, %172, %cst_132 {dimension_numbers = #tpu.dot_dimension_numbers<[1], [0], [0], [1], [0, 0, 1, 1], [], []>} : vector<1x36xf32>, vector<36x32xf32>, vector<1x32xf32> -> vector<1x32xf32>
    %174 = arith.addf %169, %173 : vector<1x32xf32>
    %175 = vector.extract_strided_slice %139 {offsets = [7, 0], sizes = [1, 36], strides = [1, 1]} : vector<8x36xf32> to vector<1x36xf32>
    %c7_133 = arith.constant 7 : index
    %c0_134 = arith.constant 0 : index
    %c0_135 = arith.constant 0 : index
    %176 = vector.load %arg5[%c7_133, %c0_134, %c0_135] : memref<8x36x32xf32, #tpu.memory_space<vmem>>, vector<1x36x32xf32>
    %177 = vector.shape_cast %176 : vector<1x36x32xf32> to vector<36x32xf32>
    %cst_136 = arith.constant dense<0.000000e+00> : vector<1x32xf32>
    %178 = tpu.matmul %175, %177, %cst_136 {dimension_numbers = #tpu.dot_dimension_numbers<[1], [0], [0], [1], [0, 0, 1, 1], [], []>} : vector<1x36xf32>, vector<36x32xf32>, vector<1x32xf32> -> vector<1x32xf32>
    %179 = arith.addf %174, %178 : vector<1x32xf32>
    %cst_137 = arith.constant 0.000000e+00 : f32
    %180 = vector.broadcast %cst_137 : f32 to vector<1x32xf32>
    %181 = arith.maximumf %179, %180 : vector<1x32xf32>
    %cst_138 = arith.constant dense<0.000000e+00> : vector<1x7xf32>
    %182 = tpu.matmul %181, %89, %cst_138 {dimension_numbers = #tpu.dot_dimension_numbers<[1], [0], [0], [1], [0, 0, 1, 1], [], []>} : vector<1x32xf32>, vector<32x7xf32>, vector<1x7xf32> -> vector<1x7xf32>
    %183 = arith.addf %182, %90 : vector<1x7xf32>
    %c1_139 = arith.constant 1 : index
    %c0_140 = arith.constant 0 : index
    %184 = vector.load %arg9[%c1_139, %c0_140] : memref<2x7xf32, #tpu.memory_space<vmem>>, vector<1x7xf32>
    tpu.vector_store %arg9[%c1_139, %c0_140], %183 {strides = array<i32>} : memref<2x7xf32, #tpu.memory_space<vmem>>, vector<1x7xf32>,
    return
  }
}

</mosaic_0001>

<bundles_post_ra>
// kernel: combined_model_forward.1
= control target key start
LH: loop header
LB: loop body
LE: loop exit
PB: predicated region body
PF: predicated region fallthrough
CT: control target
= control target key end

     0   :  { %s3321_s0 = inlined_call_operand.vmem [shape: f32[4,512], index: 0, kind: input, shape index: {}]   ;;  %s3322_s1 = inlined_call_operand.vmem [shape: f32[9,8,4], index: 1, kind: input, shape index: {}]   ;;  %s3323_s2 = inlined_call_operand.vmem [shape: f32[8,1], index: 2, kind: input, shape index: {}]   ;;  %s3324_s3 = inlined_call_operand.vmem [shape: f32[9,1,512], index: 3, kind: input, shape index: {}]   ;;  %s3325_s4 = inlined_call_operand.vmem [shape: f32[256,36], index: 4, kind: input, shape index: {}]   ;;  %s3326_s5 = inlined_call_operand.vmem [shape: f32[8,36,32], index: 5, kind: input, shape index: {}]   ;;  %s3327_s6 = inlined_call_operand.vmem [shape: f32[1,32], index: 6, kind: input, shape index: {}]   ;;  %s3328_s7 = inlined_call_operand.vmem [shape: f32[32,7], index: 7, kind: input, shape index: {}]   ;;  %s3329_s8 = inlined_call_operand.vmem [shape: f32[1,7], index: 8, kind: input, shape index: {}]   ;;  %s3330_s9 = inlined_call_operand.hbm [shape: f32[2,7], index: 9, kind: output, shape index: {}]  }
   0x1   :  { %v2284_v0 = vld [vmem:[%s3321_s0 + $0x8] sm:$0xff]  ;;  %v2289_v1 = vld [vmem:[%s3321_s0] sm:$0xff] }
   0x2   :  { %39 = vst [vmem:[#allocation1 + $0x10] ss:$2 sm:$0xff] %v2284_v0 }
   0x3   :  { %37 = vst [vmem:[#allocation1] ss:$2 sm:$0xff] %v2289_v1 }
   0x4   :  { %14 = vsyncpa [#allocation3], 0  ;;  %s2221_s13 = smov 17   ;;  %v2030_v6 = vld [vmem:[%s3324_s3 + $0x10] sm:$0xf]  ;;  %s2222_s15 = smov 16   ;;  %v56_v53 = vlaneseq }
   0x5   :  { %v597_v9 = vperm.slane %v2030_v6, 3  ;;  %v595_v12 = vperm.slane %v2030_v6, 1  ;;  %v596_v13 = vperm.slane %v2030_v6, 2  ;;  %vm123_vm0 = vcmask 1043456   ;;  %s2223_s16 = smov 15   ;;  %s2224_s17 = smov 1  }
   0x6   :  { %v594_v15 = vperm.slane %v2030_v6, 0  ;;  %v2225_v33 = vmov 0   ;;  %s2226_s18 = smov 127   ;;  %s2227_s19 = smov 113   ;;  %v1272_v49 = vld [vmem:[%s3323_s2] sm:$0xff]  ;;  %v2362_v54 = vand.u32 127, %v56_v53 }
   0x7   :  { %v599_v14 = vrot.slane %v597_v9, 4  ;;  %v598_v16 = vrot.slane %v595_v12, 4  ;;  %2194 = vset.pattern.permute.xlu0 %v2225_v33  ;;  %s2228_s20 = smov 112   ;;  %s2229_s21 = smov 111   ;;  %v2367_v55 = vld [vmem:[%s3324_s3 + $0x4] sm:$0xf] }
   0x8   :  { %vm97_vm1 = vcmp.lt.s32.totalorder %v2362_v54, 16  ;;  %v105_v57 = vperm.slane %v2367_v55, 0  ;;  %v2381_v61 = vld [vmem:[%s3324_s3] sm:$0xf]  ;;  %v2386_v63 = vld [vmem:[%s3322_s1 + $0x8] sm:$0xff]  ;;  %vm119_vm2 = vcmask 31744  }
   0x9   :  { %v2293_v2 = vld.sshfl [vmem:[#allocation1 + $0x10] sm:$0xff pattern:$0x75316420]  ;;  %v43_v3 = vld.sshfl [vmem:[#allocation1 + $0x18] sm:$0xff pattern:$0x75316420]  ;;  %v601_v19 = vsel %vm123_vm0, %v596_v13, %v599_v14  ;;  %v600_v22 = vsel %vm123_vm0, %v594_v15, %v598_v16 }
   0xa   :  { %80 = vst [vmem:[#allocation1 + $0x10] ss:$2 sm:$0xff] %v2284_v0  ;;  %v41_v4 = vld.sshfl [vmem:[#allocation1 + $0x8] sm:$0xff pattern:$0x75316420]  ;;  %v605_v23 = vmul.f32 %v601_v19, %v2284_v0  ;;  %v604_v24 = vmul.f32 %v600_v22, %v2289_v1  ;;  %vm58_vm3 = vcmp.lt.s32.totalorder %v2362_v54, 17 }
   0xb   :  { %50 = vrot.lane.b32.xlu2 %v41_v4, %s2221_s13  ;;  %v40_v5 = vld.sshfl [vmem:[#allocation1] sm:$0xff pattern:$0x75316420]  ;;  %v2417_v13 = vld [vmem:[%s3324_s3 + $0x8] sm:$0xf]  ;;  %vm330_vm4 = vcmp.lt.s32.totalorder %v2362_v54, 15 }
   0xc   :  { %78 = vst [vmem:[#allocation1] ss:$2 sm:$0xff] %v2289_v1  ;;  %v2412_v12 = vld [vmem:[%s3322_s1] sm:$0xff]  ;;  %v338_v15 = vperm.slane %v2417_v13, 0  ;;  %v339_v16 = vperm.slane %v2417_v13, 1  ;;  %v2439_v22 = vld [vmem:[%s3322_s1 + $0x10] sm:$0xff] }
   0xd   :  { %vm470_vm5 = vcmp.lt.s32.totalorder %v2362_v54, 1  ;;  %vm731_vm6 = vcmp.lt.s32.totalorder %v2362_v54, 127  ;;  %vm871_vm7 = vcmp.lt.s32.totalorder %v2362_v54, 113  ;;  %vm1011_vm8 = vcmp.lt.s32.totalorder %v2362_v54, 112  ;;  %s1983_s26 = sshll.u32 %s3330_s9, 4  ;;  %s1984_s26 = int_to_ptr.hbm [resolvable:$true] %s1983_s26 }
   0xe   :  { %vm1151_vm9 = vcmp.lt.s32.totalorder %v2362_v54, 111  ;;  %vm1369_vm10 = vcmask 293888   ;;  %vm1629_vm11 = vcmask 261120   ;;  %vm1653_vm12 = vcmask 49152  }
  0x11   :  { %v84_v7 = vld.sshfl [vmem:[#allocation1 + $0x18] sm:$0xff pattern:$0x75316420]  ;;  %v2301_v8 = vld.sshfl [vmem:[#allocation1 + $0x10] sm:$0xff pattern:$0x75316420] }
  0x12   :  { %95 = vrot.lane.b32.xlu1 %v84_v7, %s2222_s15  ;;  %313 = vst [vmem:[#allocation1 + $0x10] ss:$2 sm:$0xff] %v2284_v0 }
  0x13   :  { %v81_v10 = vld.sshfl [vmem:[#allocation1] sm:$0xff pattern:$0x75316420]  ;;  %54 = vrot.lane.b32.xlu2 %v43_v3, %s2221_s13  ;;  %v82_v11 = vld.sshfl [vmem:[#allocation1 + $0x8] sm:$0xff pattern:$0x75316420] }
  0x14   :  { %89 = vrot.lane.b32.xlu0 %v81_v10, %s2222_s15  ;;  %311 = vst [vmem:[#allocation1] ss:$2 sm:$0xff] %v2289_v1  ;;  %v106_v3 = vperm.slane %v2367_v55, 1 }
  0x19   :  { %v2308_v17 = vld.sshfl [vmem:[#allocation1 + $0x10] sm:$0xff pattern:$0x75316420]  ;;  %v317_v18 = vld.sshfl [vmem:[#allocation1 + $0x18] sm:$0xff pattern:$0x75316420] }
  0x1a   :  { %48 = vrot.lane.b32.xlu1 %v40_v5, %s2221_s13  ;;  %453 = vst [vmem:[#allocation1 + $0x10] ss:$2 sm:$0xff] %v2284_v0 }
  0x1b   :  { %328 = vrot.lane.b32.xlu2 %v317_v18, %s2223_s16  ;;  %v315_v20 = vld.sshfl [vmem:[#allocation1 + $0x8] sm:$0xff pattern:$0x75316420]  ;;  %v314_v21 = vld.sshfl [vmem:[#allocation1] sm:$0xff pattern:$0x75316420] }
  0x1c   :  { %91 = vrot.lane.b32.xlu0 %v82_v11, %s2222_s15  ;;  %451 = vst [vmem:[#allocation1] ss:$2 sm:$0xff] %v2289_v1 }
  0x21   :  { %v456_v25 = vld.sshfl [vmem:[#allocation1 + $0x10] sm:$0xff pattern:$0x75316420]  ;;  %v457_v26 = vld.sshfl [vmem:[#allocation1 + $0x18] sm:$0xff pattern:$0x75316420] }
  0x22   :  { %324 = vrot.lane.b32.xlu1 %v315_v20, %s2223_s16  ;;  %612 = vst [vmem:[#allocation1 + $0x10] ss:$2 sm:$0xff] %v605_v23 }
  0x23   :  { %468 = vrot.lane.b32.xlu2 %v457_v26, %s2224_s17  ;;  %v455_v27 = vld.sshfl [vmem:[#allocation1 + $0x8] sm:$0xff pattern:$0x75316420]  ;;  %v454_v28 = vld.sshfl [vmem:[#allocation1] sm:$0xff pattern:$0x75316420] }
  0x24   :  { %322 = vrot.lane.b32.xlu0 %v314_v21, %s2223_s16  ;;  %610 = vst [vmem:[#allocation1] ss:$2 sm:$0xff] %v604_v24  ;;  %v2446_v24 = vld [vmem:[%s3324_s3 + $0xc] sm:$0xf] }
  0x25   :  { %v478_v26 = vperm.slane %v2446_v24, 0 }
  0x29   :  { %v2322_v29 = vld.sshfl [vmem:[#allocation1 + $0x10] sm:$0xff pattern:$0x75316420]  ;;  %v2324_v30 = vld.sshfl [vmem:[#allocation1 + $0x18] sm:$0xff pattern:$0x75316420] }
  0x2a   :  { %714 = vst [vmem:[#allocation1 + $0x10] ss:$2 sm:$0xff] %v2284_v0  ;;  %464 = vrot.lane.b32.xlu1 %v455_v27, %s2224_s17  ;;  %v479_v27 = vperm.slane %v2446_v24, 1 }
  0x2b   :  { %v2328_v31 = vld.sshfl [vmem:[#allocation1] sm:$0xff pattern:$0x75316420]  ;;  %v2330_v32 = vld.sshfl [vmem:[#allocation1 + $0x8] sm:$0xff pattern:$0x75316420] }
  0x2c   :  { %462 = vrot.lane.b32.xlu0 %v454_v28, %s2224_s17  ;;  %712 = vst [vmem:[#allocation1] ss:$2 sm:$0xff] %v2289_v1 }
  0x31   :  { %v717_v34 = vld.sshfl [vmem:[#allocation1 + $0x10] sm:$0xff pattern:$0x75316420]  ;;  %v718_v35 = vld.sshfl [vmem:[#allocation1 + $0x18] sm:$0xff pattern:$0x75316420] }
  0x32   :  { %727 = vrot.lane.b32.xlu2 %v717_v34, %s2226_s18  ;;  %854 = vst [vmem:[#allocation1 + $0x10] ss:$2 sm:$0xff] %v2284_v0 }
  0x33   :  { %v716_v36 = vld.sshfl [vmem:[#allocation1 + $0x8] sm:$0xff pattern:$0x75316420]  ;;  %v715_v37 = vld.sshfl [vmem:[#allocation1] sm:$0xff pattern:$0x75316420] }
  0x34   :  { %725 = vrot.lane.b32.xlu1 %v716_v36, %s2226_s18  ;;  %723 = vrot.lane.b32.xlu0 %v715_v37, %s2226_s18  ;;  %852 = vst [vmem:[#allocation1] ss:$2 sm:$0xff] %v2289_v1  ;;  %v2468_v37 = vld [vmem:[%s3322_s1 + $0x18] sm:$0xff] }
  0x39   :  { %v857_v38 = vld.sshfl [vmem:[#allocation1 + $0x10] sm:$0xff pattern:$0x75316420]  ;;  %v858_v39 = vld.sshfl [vmem:[#allocation1 + $0x18] sm:$0xff pattern:$0x75316420] }
  0x3a   :  { %867 = vrot.lane.b32.xlu2 %v857_v38, %s2227_s19  ;;  %994 = vst [vmem:[#allocation1 + $0x10] ss:$2 sm:$0xff] %v2284_v0  ;;  %v2473_v38 = vld [vmem:[%s3324_s3 + $0x14] sm:$0xf] }
  0x3b   :  { %v856_v40 = vld.sshfl [vmem:[#allocation1 + $0x8] sm:$0xff pattern:$0x75316420]  ;;  %v855_v41 = vld.sshfl [vmem:[#allocation1] sm:$0xff pattern:$0x75316420] }
  0x3c   :  { %865 = vrot.lane.b32.xlu1 %v856_v40, %s2227_s19  ;;  %863 = vrot.lane.b32.xlu0 %v855_v41, %s2227_s19  ;;  %992 = vst [vmem:[#allocation1] ss:$2 sm:$0xff] %v2289_v1  ;;  %v740_v40 = vperm.slane %v2473_v38, 1  ;;  %v739_v41 = vperm.slane %v2473_v38, 0 }
  0x41   :  { %v997_v42 = vld.sshfl [vmem:[#allocation1 + $0x10] sm:$0xff pattern:$0x75316420]  ;;  %v998_v43 = vld.sshfl [vmem:[#allocation1 + $0x18] sm:$0xff pattern:$0x75316420] }
  0x42   :  { %1007 = vrot.lane.b32.xlu2 %v997_v42, %s2228_s20  ;;  %1134 = vst [vmem:[#allocation1 + $0x10] ss:$2 sm:$0xff] %v2284_v0  ;;  %v65_v0 = vperm.slane %v2381_v61, 0 }
  0x43   :  { %v996_v44 = vld.sshfl [vmem:[#allocation1 + $0x8] sm:$0xff pattern:$0x75316420]  ;;  %v995_v45 = vld.sshfl [vmem:[#allocation1] sm:$0xff pattern:$0x75316420] }
  0x44   :  { %1005 = vrot.lane.b32.xlu1 %v996_v44, %s2228_s20  ;;  %1003 = vrot.lane.b32.xlu0 %v995_v45, %s2228_s20  ;;  %1132 = vst [vmem:[#allocation1] ss:$2 sm:$0xff] %v2289_v1  ;;  %v66_v1 = vperm.slane %v2381_v61, 1 }
  0x49   :  { %v1137_v46 = vld.sshfl [vmem:[#allocation1 + $0x10] sm:$0xff pattern:$0x75316420]  ;;  %v1138_v50 = vld.sshfl [vmem:[#allocation1 + $0x18] sm:$0xff pattern:$0x75316420] }
  0x4a   :  { %1147 = vrot.lane.b32.xlu2 %v1137_v46, %s2229_s21 }
  0x4b   :  { %v1136_v47 = vld.sshfl [vmem:[#allocation1 + $0x8] sm:$0xff pattern:$0x75316420]  ;;  %v1135_v48 = vld.sshfl [vmem:[#allocation1] sm:$0xff pattern:$0x75316420] }
  0x4c   :  { %1145 = vrot.lane.b32.xlu1 %v1136_v47, %s2229_s21  ;;  %1143 = vrot.lane.b32.xlu0 %v1135_v48, %s2229_s21 }
  0x52   :  { %52 = vrot.lane.b32.xlu2 %v2293_v2, %s2221_s13 }
  0x54   :  { %93 = vrot.lane.b32.xlu1 %v2301_v8, %s2222_s15  ;;  %1275 = vperm.xlu0 %2194, %v1272_v49  }
  0x5a   :  { %466 = vrot.lane.b32.xlu2 %v456_v25, %s2224_s17 }
  0x5c   :  { %326 = vrot.lane.b32.xlu1 %v2308_v17, %s2223_s16  ;;  %729 = vrot.lane.b32.xlu0 %v718_v35, %s2226_s18 }
  0x62   :  { %1009 = vrot.lane.b32.xlu2 %v998_v43, %s2228_s20 }
  0x64   :  { %869 = vrot.lane.b32.xlu1 %v858_v39, %s2227_s19  ;;  %1149 = vrot.lane.b32.xlu0 %v1138_v50, %s2229_s21 }
  0x65   :  { %v2358_v51 = vpop.permute.xlu2 %50 }
  0x6d   :  { %v2360_v52 = vpop.permute.xlu2 %54 }
  0x75   :  { %v2373_v58 = vpop.permute.xlu2 %328 }
  0x7d   :  { %v2403_v8 = vpop.permute.xlu2 %468 }
  0x84   :  { %v2369_v56 = vpop.permute.xlu1 %95 }
  0x86   :  { %v90_v59 = vpop.permute.xlu0 %89 }
  0x87   :  { %v101_v60 = vsel %vm97_vm1, %v2369_v56, %v90_v59 }
  0x88   :  { %v113_v62 = vmul.f32 %v105_v57, %v101_v60 }
  0x8a   :  { %1994 = vmatpush.msk.msra.mxu0 %vm123_vm0, %v113_v62 }
  0x8b   :  { %1995 = vmatmul.msk.f32.vlgmr.msra.gmra.mxu0 %vm119_vm2, %v2386_v63 }
  0x8c   :  { %v49_v2 = vpop.permute.xlu1 %48  ;;  %v2441_v23 = vpop.permute.xlu2 %727 }
  0x8d   :  { %v61_v4 = vsel %vm58_vm3, %v49_v2, %v2358_v51  ;;  %v62_v5 = vsel %vm58_vm3, %v2360_v52, %v49_v2  ;;  %v2535_v2 = vld [vmem:[%s3324_s3 + $0x1c] sm:$0xf] }
  0x8e   :  { %v73_v6 = vmul.f32 %v65_v0, %v62_v5  ;;  %v2401_v7 = vpop.permute.xlu0 %91  ;;  %v74_v10 = vmul.f32 %v66_v1, %v61_v4  ;;  %v2530_v1 = vld [vmem:[%s3322_s1 + $0x28] sm:$0xff]  ;;  %v1019_v4 = vperm.slane %v2535_v2, 0 }
  0x8f   :  { %v100_v9 = vsel %vm97_vm1, %v90_v59, %v2401_v7 }
  0x90   :  { %v114_v11 = vmul.f32 %v106_v3, %v100_v9  ;;  %2002 = vmatpush.msk.msrb.mxu0 %vm123_vm0, %v73_v6  ;;  %v1020_v3 = vperm.slane %v2535_v2, 1 }
  0x92   :  { %1996 = vmatpush.msk.msra.mxu1 %vm123_vm0, %v114_v11 }
  0x93   :  { %1997 = vmatmul.msk.f32.vlgmr.msra.gmra.mxu1 %vm119_vm2, %v2386_v63  ;;  %2003 = vmatmul.msk.f32.vlgmr.msrb.gmra.mxu0 %vm119_vm2, %v2412_v12 }
  0x94   :  { %2004 = vmatpush.msk.msrb.mxu1 %vm123_vm0, %v74_v10  ;;  %v2425_v14 = vpop.permute.xlu1 %324  ;;  %v2477_v39 = vpop.permute.xlu2 %867 }
  0x96   :  { %v323_v17 = vpop.permute.xlu0 %322 }
  0x97   :  { %v333_v18 = vsel %vm330_vm4, %v323_v17, %v2425_v14  ;;  %v334_v19 = vsel %vm330_vm4, %v2373_v58, %v323_v17  ;;  %v2559_v17 = vld [vmem:[%s3322_s1 + $0x30] sm:$0xff] }
  0x98   :  { %v346_v20 = vmul.f32 %v338_v15, %v334_v19  ;;  %v347_v21 = vmul.f32 %v339_v16, %v333_v18  ;;  %v2564_v18 = vld [vmem:[%s3324_s3 + $0x20] sm:$0xf] }
  0x99   :  { %v1160_v19 = vperm.slane %v2564_v18, 1 }
  0x9a   :  { %2012 = vmatpush.msk.msra.mxu0 %vm123_vm0, %v346_v20  ;;  %2014 = vmatpush.msk.msra.mxu1 %vm123_vm0, %v347_v21  ;;  %v1159_v20 = vperm.slane %v2564_v18, 0 }
  0x9b   :  { %2005 = vmatmul.msk.f32.vlgmr.msrb.gmra.mxu1 %vm119_vm2, %v2412_v12  ;;  %2013 = vmatmul.msk.f32.vlgmr.msra.gmra.mxu0 %vm119_vm2, %v2439_v22 }
  0x9c   :  { %v2454_v25 = vpop.permute.xlu1 %464  ;;  %v2517_v50 = vpop.permute.xlu2 %1007 }
  0x9e   :  { %v463_v28 = vpop.permute.xlu0 %462 }
  0x9f   :  { %v473_v33 = vsel %vm470_vm5, %v463_v28, %v2454_v25  ;;  %v474_v34 = vsel %vm470_vm5, %v2403_v8, %v463_v28 }
  0xa0   :  { %v486_v35 = vmul.f32 %v478_v26, %v474_v34  ;;  %v487_v36 = vmul.f32 %v479_v27, %v473_v33 }
  0xa2   :  { %2022 = vmatpush.msk.msrb.mxu0 %vm123_vm0, %v486_v35  ;;  %2024 = vmatpush.msk.msrb.mxu1 %vm123_vm0, %v487_v36  ;;  %v2586_v35 = vld [vmem:[%s3322_s1 + $0x38] sm:$0xff] }
  0xa3   :  { %2015 = vmatmul.msk.f32.vlgmr.msra.gmra.mxu1 %vm119_vm2, %v2439_v22  ;;  %2023 = vmatmul.msk.f32.vlgmr.msrb.gmra.mxu0 %vm119_vm2, %v2468_v37 }
  0xa4   :  { %2032 = vmatpush.msk.msra.mxu0 %vm123_vm0, %v2328_v31  ;;  %2034 = vmatpush.msk.msra.mxu1 %vm123_vm0, %v2330_v32  ;;  %v2501_v31 = vld [vmem:[%s3322_s1 + $0x20] sm:$0xff]  ;;  %v2506_v32 = vld [vmem:[%s3324_s3 + $0x18] sm:$0xf]  ;;  %v2554_v11 = vpop.permute.xlu2 %1147 }
  0xa5   :  { %v880_v48 = vperm.slane %v2506_v32, 1  ;;  %v879_v49 = vperm.slane %v2506_v32, 0 }
  0xa6   :  { %v726_v42 = vpop.permute.xlu1 %725  ;;  %v2490_v43 = vpop.permute.xlu0 %723 }
  0xa7   :  { %v733_v44 = vsel %vm731_vm6, %v726_v42, %v2441_v23  ;;  %v734_v45 = vsel %vm731_vm6, %v2490_v43, %v726_v42  ;;  %v67_v42 = vperm.slane %v2381_v61, 2 }
  0xa8   :  { %v748_v46 = vmul.f32 %v740_v40, %v733_v44  ;;  %v747_v47 = vmul.f32 %v739_v41, %v734_v45  ;;  %v107_v40 = vperm.slane %v2367_v55, 2  ;;  %v108_v41 = vperm.slane %v2367_v55, 3 }
  0xa9   :  { %v68_v44 = vperm.slane %v2381_v61, 3 }
  0xaa   :  { %2042 = vmatpush.msk.msrb.mxu0 %vm123_vm0, %v747_v47 }
  0xab   :  { %2025 = vmatmul.msk.f32.vlgmr.msrb.gmra.mxu1 %vm119_vm2, %v2468_v37  ;;  %2033 = vmatmul.msk.f32.vlgmr.msra.gmra.mxu0 %vm119_vm2, %v2501_v31 }
  0xac   :  { %2044 = vmatpush.msk.msrb.mxu1 %vm123_vm0, %v748_v46  ;;  %v53_v36 = vpop.permute.xlu2 %52 }
  0xad   :  { %v59_v46 = vsel %vm58_vm3, %v53_v36, %v2360_v52  ;;  %v60_v47 = vsel %vm58_vm3, %v2358_v51, %v53_v36  ;;  %v2615_v51 = vld [vmem:[%s3322_s1 + $0x40] sm:$0xff] }
  0xae   :  { %v866_v53 = vpop.permute.xlu1 %865  ;;  %v2519_v57 = vpop.permute.xlu0 %863  ;;  %v75_v61 = vmul.f32 %v67_v42, %v60_v47  ;;  %v2764_v42 = vld [vmem:[%s3325_s4 + $0x58] sm:$0xff]  ;;  %v2786_v47 = vld [vmem:[%s3325_s4 + $0x48] sm:$0xff] }
  0xaf   :  { %v873_v59 = vsel %vm871_vm7, %v866_v53, %v2477_v39  ;;  %v874_v60 = vsel %vm871_vm7, %v2519_v57, %v866_v53 }
  0xb0   :  { %v888_v62 = vmul.f32 %v880_v48, %v873_v59  ;;  %v887_v0 = vmul.f32 %v879_v49, %v874_v60  ;;  %v76_v59 = vmul.f32 %v68_v44, %v59_v46  ;;  %v480_v60 = vperm.slane %v2446_v24, 2  ;;  %v2769_v44 = vld [vmem:[%s3325_s4 + $0xf8] sm:$0xff]  ;;  %v2781_v46 = vld [vmem:[%s3325_s4 + $0xf0] sm:$0xff] }
  0xb2   :  { %2052 = vmatpush.msk.msra.mxu0 %vm123_vm0, %v887_v0 }
  0xb3   :  { %2035 = vmatmul.msk.f32.vlgmr.msra.gmra.mxu1 %vm119_vm2, %v2501_v31  ;;  %2043 = vmatmul.msk.f32.vlgmr.msrb.gmra.mxu0 %vm119_vm2, %v2530_v1 }
  0xb4   :  { %2054 = vmatpush.msk.msra.mxu1 %vm123_vm0, %v888_v62  ;;  %v467_v52 = vpop.permute.xlu2 %466  ;;  %v481_v62 = vperm.slane %v2446_v24, 3 }
  0xb5   :  { %v471_v0 = vsel %vm470_vm5, %v467_v52, %v2403_v8  ;;  %v741_v8 = vperm.slane %v2473_v38, 2 }
  0xb6   :  { %v1006_v5 = vpop.permute.xlu1 %1005  ;;  %v2546_v6 = vpop.permute.xlu0 %1003 }
  0xb7   :  { %v1013_v9 = vsel %vm1011_vm8, %v1006_v5, %v2517_v50  ;;  %v1014_v10 = vsel %vm1011_vm8, %v2546_v6, %v1006_v5 }
  0xb8   :  { %v1028_v15 = vmul.f32 %v1020_v3, %v1013_v9  ;;  %v1027_v16 = vmul.f32 %v1019_v4, %v1014_v10  ;;  %v472_v3 = vsel %vm470_vm5, %v2454_v25, %v467_v52  ;;  %v489_v10 = vmul.f32 %v481_v62, %v471_v0  ;;  %v2824_v52 = vld [vmem:[%s3325_s4 + $0x30] sm:$0xff]  ;;  %v2848_v62 = vld [vmem:[%s3325_s4 + $0x20] sm:$0xff] }
  0xb9   :  { %v488_v24 = vmul.f32 %v480_v60, %v472_v3  ;;  %v2841_v60 = vld [vmem:[%s3325_s4 + $0xc8] sm:$0xff] }
  0xba   :  { %2062 = vmatpush.msk.msrb.mxu0 %vm123_vm0, %v1027_v16 }
  0xbb   :  { %2045 = vmatmul.msk.f32.vlgmr.msrb.gmra.mxu1 %vm119_vm2, %v2530_v1  ;;  %2053 = vmatmul.msk.f32.vlgmr.msra.gmra.mxu0 %vm119_vm2, %v2559_v17 }
  0xbc   :  { %2064 = vmatpush.msk.msrb.mxu1 %vm123_vm0, %v1028_v15 }
  0xbe   :  { %v1146_v21 = vpop.permute.xlu1 %1145  ;;  %v2575_v26 = vpop.permute.xlu0 %1143 }
  0xbf   :  { %v1153_v27 = vsel %vm1151_vm9, %v1146_v21, %v2554_v11  ;;  %v1154_v28 = vsel %vm1151_vm9, %v2575_v26, %v1146_v21 }
  0xc0   :  { %v1168_v33 = vmul.f32 %v1160_v19, %v1153_v27  ;;  %v1167_v34 = vmul.f32 %v1159_v20, %v1154_v28 }
  0xc2   :  { %2072 = vmatpush.msk.msra.mxu0 %vm123_vm0, %v1167_v34 }
  0xc3   :  { %2055 = vmatmul.msk.f32.vlgmr.msra.gmra.mxu1 %vm119_vm2, %v2559_v17  ;;  %2063 = vmatmul.msk.f32.vlgmr.msrb.gmra.mxu0 %vm119_vm2, %v2586_v35 }
  0xc4   :  { %2074 = vmatpush.msk.msra.mxu1 %vm123_vm0, %v1168_v33 }
  0xc6   :  { %v94_v45 = vpop.permute.xlu1 %93  ;;  %v2643_v15 = vpop.permute.xlu0 %1275 }
  0xc7   :  { %v98_v48 = vsel %vm97_vm1, %v94_v45, %v2369_v56  ;;  %v99_v55 = vsel %vm97_vm1, %v2401_v7, %v94_v45  ;;  %v340_v56 = vperm.slane %v2417_v13, 2  ;;  %v341_v7 = vperm.slane %v2417_v13, 3  ;;  %v2774_v45 = vld [vmem:[%s3325_s4 + $0x50] sm:$0xff] }
  0xc8   :  { %v115_v49 = vmul.f32 %v107_v40, %v99_v55  ;;  %v116_v53 = vmul.f32 %v108_v41, %v98_v48  ;;  %v2791_v48 = vld [vmem:[%s3325_s4 + $0xe8] sm:$0xff]  ;;  %v2798_v55 = vld [vmem:[%s3325_s4 + $0x40] sm:$0xff] }
  0xca   :  { %1998 = vmatpush.msk.msra.mxu2 %vm123_vm0, %v115_v49  ;;  %2000 = vmatpush.msk.msra.mxu3 %vm123_vm0, %v116_v53  ;;  %v2803_v49 = vld [vmem:[%s3325_s4 + $0xe0] sm:$0xff] }
  0xcb   :  { %1999 = vmatmul.msk.f32.vlgmr.msra.gmra.mxu2 %vm119_vm2, %v2386_v63  ;;  %2001 = vmatmul.msk.f32.vlgmr.msra.gmra.mxu3 %vm119_vm2, %v2386_v63 }
  0xcc   :  { %2006 = vmatpush.msk.msrb.mxu2 %vm123_vm0, %v75_v61  ;;  %2008 = vmatpush.msk.msrb.mxu3 %vm123_vm0, %v76_v59  ;;  %v2814_v59 = vld [vmem:[%s3325_s4 + $0x38] sm:$0xff] }
  0xcd   :  { %2065 = vmatmul.msk.f32.vlgmr.msrb.gmra.mxu1 %vm119_vm2, %v2586_v35  ;;  %2073 = vmatmul.msk.f32.vlgmr.msra.gmra.mxu0 %vm119_vm2, %v2615_v51 }
  0xce   :  { %v327_v63 = vpop.permute.xlu1 %326  ;;  %1344 = vmatpush.msrb.mxu1 %v2769_v44 }
  0xcf   :  { %v331_v13 = vsel %vm330_vm4, %v327_v63, %v2373_v58  ;;  %v332_v4 = vsel %vm330_vm4, %v2425_v14, %v327_v63  ;;  %v730_v58 = vpop.permute.xlu0 %729  ;;  %v2853_v63 = vld [vmem:[%s3325_s4 + $0xc0] sm:$0xff] }
  0xd0   :  { %v348_v5 = vmul.f32 %v340_v56, %v332_v4  ;;  %v349_v9 = vmul.f32 %v341_v7, %v331_v13  ;;  %v732_v14 = vsel %vm731_vm6, %v2441_v23, %v730_v58  ;;  %v735_v25 = vsel %vm731_vm6, %v730_v58, %v2490_v43  ;;  %1345 = vmatpush.msrb.mxu1 %v2781_v46  ;;  %v2831_v56 = vld [vmem:[%s3325_s4 + $0xd0] sm:$0xff]  ;;  %v2836_v7 = vld [vmem:[%s3325_s4 + $0x28] sm:$0xff]  ;;  %v2862_v13 = vld [vmem:[%s3325_s4 + $0x18] sm:$0xff] }
  0xd1   :  { %v882_v23 = vperm.slane %v2506_v32, 3  ;;  %v2867_v4 = vld [vmem:[%s3325_s4 + $0xb8] sm:$0xff]  ;;  %v1286_v58 = vld [vmem:[%s3325_s4] sm:$0xff] }
  0xd2   :  { %2016 = vmatpush.msk.msra.mxu2 %vm123_vm0, %v348_v5  ;;  %2018 = vmatpush.msk.msra.mxu3 %vm123_vm0, %v349_v9  ;;  %v2874_v5 = vld [vmem:[%s3325_s4 + $0x10] sm:$0xff] }
  0xd3   :  { %2007 = vmatmul.msk.f32.vlgmr.msrb.gmra.mxu2 %vm119_vm2, %v2412_v12  ;;  %2009 = vmatmul.msk.f32.vlgmr.msrb.gmra.mxu3 %vm119_vm2, %v2412_v12  ;;  %v742_v12 = vperm.slane %v2473_v38, 3  ;;  %v2879_v9 = vld [vmem:[%s3325_s4 + $0xb0] sm:$0xff] }
  0xd4   :  { %2026 = vmatpush.msk.msrb.mxu2 %vm123_vm0, %v488_v24  ;;  %2028 = vmatpush.msk.msrb.mxu3 %vm123_vm0, %v489_v10  ;;  %v1287_v24 = vld [vmem:[%s3325_s4 + $0x8] sm:$0xff] }
  0xd5   :  { %2075 = vmatmul.msk.f32.vlgmr.msra.gmra.mxu1 %vm119_vm2, %v2615_v51  ;;  %v750_v16 = vmul.f32 %v742_v12, %v735_v25  ;;  %v2889_v10 = vld [vmem:[%s3325_s4 + $0xa8] sm:$0xff]  ;;  %v2904_v25 = vld [vmem:[%s3325_s4 + $0x98] sm:$0xff] }
  0xd6   :  { %1346 = vmatpush.msrb.mxu1 %v2791_v48 }
  0xd8   :  { %1347 = vmatpush.msrb.mxu1 %v2803_v49 }
  0xdb   :  { %2017 = vmatmul.msk.f32.vlgmr.msra.gmra.mxu2 %vm119_vm2, %v2439_v22  ;;  %2019 = vmatmul.msk.f32.vlgmr.msra.gmra.mxu3 %vm119_vm2, %v2439_v22  ;;  %v749_v22 = vmul.f32 %v741_v8, %v732_v14  ;;  %v2898_v8 = vld [vmem:[%s3325_s4 + $0xa0] sm:$0xff] }
  0xdc   :  { %2036 = vmatpush.msk.msra.mxu2 %vm123_vm0, %v2322_v29  ;;  %2038 = vmatpush.msk.msra.mxu3 %vm123_vm0, %v2324_v30  ;;  %v870_v29 = vpop.permute.xlu1 %869  ;;  %v881_v30 = vperm.slane %v2506_v32, 2  ;;  %v1021_v32 = vperm.slane %v2535_v2, 2 }
  0xdd   :  { %v872_v38 = vsel %vm871_vm7, %v2477_v39, %v870_v29  ;;  %v875_v43 = vsel %vm871_vm7, %v870_v29, %v2519_v57  ;;  %v1022_v39 = vperm.slane %v2535_v2, 3  ;;  %v1161_v2 = vperm.slane %v2564_v18, 2  ;;  %v2922_v29 = vld [vmem:[%s3325_s4 + $0x80] sm:$0xff] }
  0xde   :  { %v889_v19 = vmul.f32 %v881_v30, %v872_v38  ;;  %v890_v20 = vmul.f32 %v882_v23, %v875_v43 }
  0xe3   :  { %2027 = vmatmul.msk.f32.vlgmr.msrb.gmra.mxu2 %vm119_vm2, %v2468_v37  ;;  %2029 = vmatmul.msk.f32.vlgmr.msrb.gmra.mxu3 %vm119_vm2, %v2468_v37  ;;  %v1010_v37 = vpop.permute.xlu2 %1009 }
  0xe4   :  { %2046 = vmatpush.msk.msrb.mxu2 %vm123_vm0, %v749_v22  ;;  %2048 = vmatpush.msk.msrb.mxu3 %vm123_vm0, %v750_v16  ;;  %v1012_v57 = vsel %vm1011_vm8, %v2517_v50, %v1010_v37  ;;  %v1015_v21 = vsel %vm1011_vm8, %v1010_v37, %v2546_v6  ;;  %v1162_v50 = vperm.slane %v2564_v18, 3  ;;  %v2741_v18 = vld [vmem:[%s3325_s4 + $0x70] sm:$0xff]  ;;  %v2916_v16 = vld [vmem:[%s3325_s4 + $0x88] sm:$0xff] }
  0xe5   :  { %v1029_v27 = vmul.f32 %v1021_v32, %v1012_v57  ;;  %v1030_v28 = vmul.f32 %v1022_v39, %v1015_v21  ;;  %v2910_v22 = vld [vmem:[%s3325_s4 + $0x90] sm:$0xff] }
  0xeb   :  { %2037 = vmatmul.msk.f32.vlgmr.msra.gmra.mxu2 %vm119_vm2, %v2501_v31  ;;  %2039 = vmatmul.msk.f32.vlgmr.msra.gmra.mxu3 %vm119_vm2, %v2501_v31  ;;  %v1150_v31 = vpop.permute.xlu0 %1149 }
  0xec   :  { %2056 = vmatpush.msk.msra.mxu2 %vm123_vm0, %v889_v19  ;;  %2058 = vmatpush.msk.msra.mxu3 %vm123_vm0, %v890_v20  ;;  %v1152_v6 = vsel %vm1151_vm9, %v2554_v11, %v1150_v31  ;;  %v1155_v33 = vsel %vm1151_vm9, %v1150_v31, %v2575_v26  ;;  %v2747_v26 = vld [vmem:[%s3325_s4 + $0x68] sm:$0xff] }
  0xed   :  { %v1169_v34 = vmul.f32 %v1161_v2, %v1152_v6  ;;  %v1170_v36 = vmul.f32 %v1162_v50, %v1155_v33 }
  0xf3   :  { %2047 = vmatmul.msk.f32.vlgmr.msrb.gmra.mxu2 %vm119_vm2, %v2530_v1  ;;  %2049 = vmatmul.msk.f32.vlgmr.msrb.gmra.mxu3 %vm119_vm2, %v2530_v1 }
  0xf4   :  { %2066 = vmatpush.msk.msrb.mxu2 %vm123_vm0, %v1029_v27  ;;  %2068 = vmatpush.msk.msrb.mxu3 %vm123_vm0, %v1030_v28 }
  0xfb   :  { %2057 = vmatmul.msk.f32.vlgmr.msra.gmra.mxu2 %vm119_vm2, %v2559_v17  ;;  %2059 = vmatmul.msk.f32.vlgmr.msra.gmra.mxu3 %vm119_vm2, %v2559_v17  ;;  %v2736_v17 = vld [vmem:[%s3325_s4 + $0x78] sm:$0xff] }
  0xfc   :  { %2076 = vmatpush.msk.msra.mxu2 %vm123_vm0, %v1169_v34  ;;  %2078 = vmatpush.msk.msra.mxu3 %vm123_vm0, %v1170_v36 }
  0xfd   :  { %1324 = vmatpush.msrb.mxu0 %v2736_v17 }
  0xff   :  { %1325 = vmatpush.msrb.mxu0 %v2741_v18 }
 0x101   :  { %1326 = vmatpush.msrb.mxu0 %v2747_v26 }
 0x103   :  { %2067 = vmatmul.msk.f32.vlgmr.msrb.gmra.mxu2 %vm119_vm2, %v2586_v35  ;;  %2069 = vmatmul.msk.f32.vlgmr.msrb.gmra.mxu3 %vm119_vm2, %v2586_v35  ;;  %v2753_v35 = vld [vmem:[%s3325_s4 + $0x60] sm:$0xff] }
 0x104   :  { %1327 = vmatpush.msrb.mxu0 %v2753_v35 }
 0x106   :  { %1328 = vmatpush.msrb.mxu0 %v2764_v42 }
 0x108   :  { %v2723_v54 = vpop.f32.mrf.mxu0  ;;  %1329 = vmatpush.msrb.mxu0 %v2774_v45 }
 0x10a   :  { %1330 = vmatpush.msrb.mxu0 %v2786_v47 }
 0x10b   :  { %2077 = vmatmul.msk.f32.vlgmr.msra.gmra.mxu2 %vm119_vm2, %v2615_v51  ;;  %2079 = vmatmul.msk.f32.vlgmr.msra.gmra.mxu3 %vm119_vm2, %v2615_v51  ;;  %v2819_v51 = vld [vmem:[%s3325_s4 + $0xd8] sm:$0xff] }
 0x10c   :  { %1331 = vmatpush.msrb.mxu0 %v2798_v55  ;;  %1348 = vmatpush.msrb.mxu1 %v2819_v51 }
 0x10e   :  { %1332 = vmatpush.msrb.mxu0 %v2814_v59  ;;  %1349 = vmatpush.msrb.mxu1 %v2831_v56 }
 0x110   :  { %v2729_v1 = vpop.f32.mrf.mxu1  ;;  %v2731_v11 = vpop.f32.mrf.mxu0  ;;  %1333 = vmatpush.msrb.mxu0 %v2824_v52  ;;  %1350 = vmatpush.msrb.mxu1 %v2841_v60 }
 0x111   :  { %v249_v38 = vadd.f32 %v2731_v11, %v2723_v54 }
 0x112   :  { %1334 = vmatpush.msrb.mxu0 %v2836_v7  ;;  %1351 = vmatpush.msrb.mxu1 %v2853_v63 }
 0x114   :  { %1335 = vmatpush.msrb.mxu0 %v2848_v62  ;;  %1352 = vmatpush.msrb.mxu1 %v2867_v4 }
 0x116   :  { %1336 = vmatpush.msrb.mxu0 %v2862_v13  ;;  %1353 = vmatpush.msrb.mxu1 %v2879_v9 }
 0x118   :  { %v2756_v40 = vpop.f32.mrf.mxu1  ;;  %v2758_v41 = vpop.f32.mrf.mxu0  ;;  %1337 = vmatpush.msrb.mxu0 %v2874_v5  ;;  %1354 = vmatpush.msrb.mxu1 %v2889_v10 }
 0x119   :  { %v447_v43 = vadd.f32 %v2758_v41, %v249_v38  ;;  %v269_v39 = vadd.f32 %v2756_v40, %v2729_v1 }
 0x11a   :  { %1338 = vmatpush.msrb.mxu0 %v1287_v24  ;;  %1355 = vmatpush.msrb.mxu1 %v2898_v8 }
 0x11c   :  { %1339 = vmatpush.msrb.mxu0 %v1286_v58  ;;  %1356 = vmatpush.msrb.mxu1 %v2904_v25 }
 0x11e   :  { %1357 = vmatpush.msrb.mxu1 %v2910_v22 }
 0x120   :  { %v2807_v53 = vpop.f32.mrf.mxu1  ;;  %v524_v61 = vpop.f32.mrf.mxu0  ;;  %1358 = vmatpush.msrb.mxu1 %v2916_v16 }
 0x121   :  { %v587_v37 = vadd.f32 %v524_v61, %v447_v43  ;;  %v448_v21 = vadd.f32 %v2807_v53, %v269_v39  ;;  %v2086_v39 = vld [vmem:[%s3326_s5 + $0x48] sm:$0xf] }
 0x122   :  { %1359 = vmatpush.msrb.mxu1 %v2922_v29  ;;  %2087 = vmatpush.msk.msrb.mxu3 %vm123_vm0, %v2086_v39  ;;  %v3175_v39 = vld [vmem:[%s3326_s5 + $0x118] sm:$0xff] }
 0x124   :  { %1655 = vmatpush.msra.mxu1 %v2736_v17 }
 0x126   :  { %1656 = vmatpush.msra.mxu1 %v2741_v18 }
 0x128   :  { %v544_v0 = vpop.f32.mrf.mxu1  ;;  %v645_v3 = vpop.f32.mrf.mxu0  ;;  %1657 = vmatpush.msra.mxu1 %v2747_v26 }
 0x129   :  { %v708_v32 = vadd.f32 %v645_v3, %v587_v37  ;;  %v588_v28 = vadd.f32 %v544_v0, %v448_v21  ;;  %v1368_v3 = vld [vmem:[%s3326_s5 + $0x20] sm:$0xf] }
 0x12a   :  { %1658 = vmatpush.msra.mxu1 %v2753_v35  ;;  %2080 = vmatpush.msk.msrb.mxu2 %vm123_vm0, %v1368_v3  ;;  %v2972_v21 = vld [vmem:[%s3326_s5 + $0x40] sm:$0xff]  ;;  %v3108_v3 = vld [vmem:[%s3326_s5 + $0xd0] sm:$0xff] }
 0x12b   :  { %1421 = vmatpush.msrb.mxu3 %v2972_v21 }
 0x12c   :  { %1659 = vmatpush.msra.mxu1 %v2764_v42 }
 0x12e   :  { %1660 = vmatpush.msra.mxu1 %v2774_v45 }
 0x130   :  { %v665_v12 = vpop.f32.mrf.mxu1  ;;  %v785_v14 = vpop.f32.mrf.mxu0  ;;  %1661 = vmatpush.msra.mxu1 %v2786_v47 }
 0x131   :  { %v848_v57 = vadd.f32 %v785_v14, %v708_v32  ;;  %v709_v6 = vadd.f32 %v665_v12, %v588_v28  ;;  %v2957_v32 = vld [vmem:[%s3326_s5 + $0x18] sm:$0xff] }
 0x132   :  { %1662 = vmatpush.msra.mxu1 %v2798_v55  ;;  %1388 = vmatpush.msrb.mxu2 %v2957_v32  ;;  %v2982_v28 = vld [vmem:[%s3326_s5 + $0x38] sm:$0xff] }
 0x133   :  { %1422 = vmatpush.msrb.mxu3 %v2982_v28 }
 0x134   :  { %1663 = vmatpush.msra.mxu1 %v2814_v59 }
 0x136   :  { %1664 = vmatpush.msra.mxu1 %v2824_v52 }
 0x138   :  { %v805_v30 = vpop.f32.mrf.mxu1  ;;  %v925_v23 = vpop.f32.mrf.mxu0  ;;  %1665 = vmatpush.msra.mxu1 %v2836_v7 }
 0x139   :  { %v988_v27 = vadd.f32 %v925_v23, %v848_v57  ;;  %v849_v34 = vadd.f32 %v805_v30, %v709_v6  ;;  %v2965_v57 = vld [vmem:[%s3326_s5 + $0x10] sm:$0xff]  ;;  %v3007_v6 = vld [vmem:[%s3326_s5 + $0x28] sm:$0xff] }
 0x13a   :  { %1666 = vmatpush.msra.mxu1 %v2848_v62  ;;  %1389 = vmatpush.msrb.mxu2 %v2965_v57 }
 0x13c   :  { %1667 = vmatpush.msra.mxu1 %v2862_v13 }
 0x13e   :  { %1668 = vmatpush.msra.mxu1 %v2874_v5 }
 0x140   :  { %v945_v19 = vpop.f32.mrf.mxu1  ;;  %v1065_v20 = vpop.f32.mrf.mxu0  ;;  %1669 = vmatpush.msra.mxu1 %v1287_v24 }
 0x141   :  { %v1128_v31 = vadd.f32 %v1065_v20, %v988_v27  ;;  %v989_v11 = vadd.f32 %v945_v19, %v849_v34  ;;  %v2977_v27 = vld [vmem:[%s3326_s5 + $0x8] sm:$0xff]  ;;  %v2100_v34 = vld [vmem:[%s3326_s5 + $0x98] sm:$0xf] }
 0x142   :  { %1670 = vmatpush.msra.mxu1 %v1286_v58  ;;  %1390 = vmatpush.msrb.mxu2 %v2977_v27 }
 0x14a   :  { %v1085_v2 = vpop.f32.mrf.mxu1  ;;  %v1205_v50 = vpop.f32.mrf.mxu0 }
 0x14b   :  { %v1268_v33 = vadd.f32 %v1205_v50, %v1128_v31  ;;  %v1129_v18 = vadd.f32 %v1085_v2, %v989_v11  ;;  %v2989_v31 = vld [vmem:[%s3326_s5] sm:$0xff]  ;;  %v2994_v2 = vld [vmem:[%s3326_s5 + $0x30] sm:$0xff]  ;;  %v3040_v11 = vld [vmem:[%s3326_s5 + $0x88] sm:$0xff] }
 0x14c   :  { %1391 = vmatpush.msrb.mxu2 %v2989_v31  ;;  %1423 = vmatpush.msrb.mxu3 %v2994_v2  ;;  %v2093_v50 = vld [vmem:[%s3326_s5 + $0x70] sm:$0xf] }
 0x14d   :  { %v1278_v36 = vadd.f32 %v2643_v15, %v1268_v33  ;;  %v3013_v33 = vld [vmem:[%s3326_s5 + $0x68] sm:$0xff] }
 0x14e   :  { %v193_v54 = vpop.f32.mrf.mxu2  ;;  %v213_v1 = vpop.f32.mrf.mxu3  ;;  %2094 = vmatpush.msk.msra.mxu2 %vm123_vm0, %v2093_v50  ;;  %1424 = vmatpush.msrb.mxu3 %v3007_v6 }
 0x14f   :  { %v1282_v17 = vmax.f32 %v1278_v36, 0.0  ;;  %v3023_v36 = vld [vmem:[%s3326_s5 + $0x60] sm:$0xff] }
 0x150   :  { %1454 = vmatpush.msra.mxu2 %v3013_v33  ;;  %2101 = vmatpush.msk.msra.mxu3 %vm123_vm0, %v2100_v34 }
 0x151   :  { %1340 = vmatmul.f32.vlgmr.msrb.gmra.mxu0 %v1282_v17  ;;  %v3045_v17 = vld [vmem:[%s3326_s5 + $0x50] sm:$0xff] }
 0x152   :  { %v1225_v26 = vpop.f32.mrf.mxu1  ;;  %1455 = vmatpush.msra.mxu2 %v3023_v36 }
 0x153   :  { %v1269_v35 = vadd.f32 %v1225_v26, %v1129_v18  ;;  %v3052_v18 = vld [vmem:[%s3326_s5 + $0x80] sm:$0xff]  ;;  %v3057_v26 = vld [vmem:[%s3326_s5 + $0x78] sm:$0xff] }
 0x155   :  { %v1279_v40 = vadd.f32 %v2643_v15, %v1269_v35 }
 0x156   :  { %v288_v41 = vpop.f32.mrf.mxu2  ;;  %v308_v42 = vpop.f32.mrf.mxu3 }
 0x157   :  { %v1283_v45 = vmax.f32 %v1279_v40, 0.0  ;;  %v309_v47 = vadd.f32 %v308_v42, %v213_v1  ;;  %v289_v0 = vadd.f32 %v288_v41, %v193_v54  ;;  %v3028_v54 = vld [vmem:[%s3326_s5 + $0x90] sm:$0xff]  ;;  %v3035_v1 = vld [vmem:[%s3326_s5 + $0x58] sm:$0xff]  ;;  %v2107_v42 = vld [vmem:[%s3326_s5 + $0xc0] sm:$0xf] }
 0x158   :  { %1487 = vmatpush.msra.mxu3 %v3028_v54  ;;  %1456 = vmatpush.msra.mxu2 %v3035_v1 }
 0x159   :  { %1360 = vmatmul.f32.vlgmr.msrb.gmra.mxu1 %v1283_v45 }
 0x15a   :  { %1488 = vmatpush.msra.mxu3 %v3040_v11  ;;  %1457 = vmatpush.msra.mxu2 %v3045_v17 }
 0x15c   :  { %1489 = vmatpush.msra.mxu3 %v3052_v18 }
 0x15e   :  { %v424_v55 = vpop.f32.mrf.mxu2  ;;  %v444_v53 = vpop.f32.mrf.mxu3  ;;  %1490 = vmatpush.msra.mxu3 %v3057_v26 }
 0x15f   :  { %v450_v61 = vadd.f32 %v444_v53, %v309_v47  ;;  %v449_v5 = vadd.f32 %v424_v55, %v289_v0  ;;  %v3069_v47 = vld [vmem:[%s3326_s5 + $0xb8] sm:$0xff]  ;;  %v2114_v55 = vld [vmem:[%s3326_s5 + $0xe8] sm:$0xf]  ;;  %v3079_v53 = vld [vmem:[%s3326_s5 + $0xb0] sm:$0xff] }
 0x160   :  { %v3103_v0 = vld [vmem:[%s3326_s5 + $0xa0] sm:$0xff] }
 0x166   :  { %v564_v59 = vpop.f32.mrf.mxu2  ;;  %v584_v52 = vpop.f32.mrf.mxu3 }
 0x167   :  { %v2947_v7 = vadd.f32 %v584_v52, %v450_v61  ;;  %v589_v24 = vadd.f32 %v564_v59, %v449_v5  ;;  %v3084_v61 = vld [vmem:[%s3326_s5 + $0xe0] sm:$0xff]  ;;  %v3091_v59 = vld [vmem:[%s3326_s5 + $0xa8] sm:$0xff]  ;;  %v3096_v52 = vld [vmem:[%s3326_s5 + $0xd8] sm:$0xff] }
 0x16e   :  { %v685_v62 = vpop.f32.mrf.mxu2 }
 0x16f   :  { %v710_v12 = vadd.f32 %v685_v62, %v589_v24  ;;  %v3119_v24 = vld [vmem:[%s3326_s5 + $0xc8] sm:$0xff] }
 0x176   :  { %v825_v13 = vpop.f32.mrf.mxu2 }
 0x177   :  { %v850_v14 = vadd.f32 %v825_v13, %v710_v12  ;;  %v2121_v13 = vld [vmem:[%s3326_s5 + $0x110] sm:$0xf]  ;;  %v2128_v12 = vld [vmem:[%s3326_s5 + $0x138] sm:$0xf] }
 0x17e   :  { %v965_v58 = vpop.f32.mrf.mxu2 }
 0x17f   :  { %v990_v23 = vadd.f32 %v965_v58, %v850_v14  ;;  %v3126_v58 = vld [vmem:[%s3326_s5 + $0x108] sm:$0xff]  ;;  %v3137_v14 = vld [vmem:[%s3326_s5 + $0x100] sm:$0xff] }
 0x186   :  { %v1105_v30 = vpop.f32.mrf.mxu2 }
 0x187   :  { %v1130_v38 = vadd.f32 %v1105_v30, %v990_v23  ;;  %v3142_v30 = vld [vmem:[%s3326_s5 + $0x130] sm:$0xff]  ;;  %v3149_v23 = vld [vmem:[%s3326_s5 + $0x128] sm:$0xff] }
 0x18e   :  { %v1245_v43 = vpop.f32.mrf.mxu2 }
 0x18f   :  { %v1270_v19 = vadd.f32 %v1245_v43, %v1130_v38  ;;  %v3156_v43 = vld [vmem:[%s3326_s5 + $0xf8] sm:$0xff] }
 0x191   :  { %v1280_v20 = vadd.f32 %v2643_v15, %v1270_v19 }
 0x193   :  { %v1284_v37 = vmax.f32 %v1280_v20, 0.0  ;;  %v3163_v20 = vld [vmem:[%s3326_s5 + $0xf0] sm:$0xff] }
 0x195   :  { %1671 = vmatmul.f32.vlgmr.msra.gmra.mxu1 %v1284_v37  ;;  %v3168_v37 = vld [vmem:[%s3326_s5 + $0x120] sm:$0xff] }
 0x1ce   :  { %v1341_v35 = vpop.f32.mrf.mxu0 }
 0x1d6   :  { %v1361_v40 = vpop.f32.mrf.mxu1 }
 0x1d7   :  { %v1362_v41 = vadd.f32 %v1361_v40, %v1341_v35  ;;  %v705_v35 = vpop.f32.mrf.mxu3 }
 0x1d9   :  { %2081 = vmatmul.msk.f32.vlgmr.msrb.gmra.mxu2 %vm1369_vm10, %v1362_v41  ;;  %v1403_v45 = vrot.slane %v1362_v41, 1  ;;  %v1436_v62 = vrot.slane %v1362_v41, 2  ;;  %v1469_v5 = vrot.slane %v1362_v41, 3  ;;  %v1502_v38 = vrot.slane %v1362_v41, 4 }
 0x1da   :  { %2108 = vmatpush.msk.msrb.mxu2 %vm123_vm0, %v2107_v42  ;;  %v1535_v19 = vrot.slane %v1362_v41, 5  ;;  %v1568_v50 = vrot.slane %v1362_v41, 6  ;;  %v1601_v34 = vrot.slane %v1362_v41, 7  ;;  %v3185_v42 = vld [vmem:[%s3328_s7 + $0x18] sm:$0xff]  ;;  %v3196_v41 = vld [vmem:[%s3328_s7 + $0x8] sm:$0xff] }
 0x1db   :  { %2088 = vmatmul.msk.f32.vlgmr.msrb.gmra.mxu3 %vm1369_vm10, %v1403_v45  ;;  %1645 = vmatpush.msra.mxu0 %v3185_v42  ;;  %v3191_v45 = vld [vmem:[%s3328_s7 + $0x10] sm:$0xff] }
 0x1dc   :  { %1520 = vmatpush.msrb.mxu2 %v3069_v47  ;;  %2115 = vmatpush.msk.msrb.mxu3 %vm123_vm0, %v2114_v55  ;;  %v3202_v55 = vld [vmem:[%s3328_s7] sm:$0xff] }
 0x1dd   :  { %1646 = vmatpush.msra.mxu0 %v3191_v45 }
 0x1de   :  { %1521 = vmatpush.msrb.mxu2 %v3079_v53  ;;  %1553 = vmatpush.msrb.mxu3 %v3084_v61 }
 0x1df   :  { %v845_v40 = vpop.f32.mrf.mxu3  ;;  %1647 = vmatpush.msra.mxu0 %v3196_v41 }
 0x1e0   :  { %1522 = vmatpush.msrb.mxu2 %v3091_v59  ;;  %1554 = vmatpush.msrb.mxu3 %v3096_v52 }
 0x1e1   :  { %2095 = vmatmul.msk.f32.vlgmr.msra.gmra.mxu2 %vm1369_vm10, %v1436_v62  ;;  %1648 = vmatpush.msra.mxu0 %v3202_v55 }
 0x1e2   :  { %1523 = vmatpush.msrb.mxu2 %v3103_v0  ;;  %1555 = vmatpush.msrb.mxu3 %v3108_v3 }
 0x1e3   :  { %2102 = vmatmul.msk.f32.vlgmr.msra.gmra.mxu3 %vm1369_vm10, %v1469_v5  ;;  %1675 = vmatpush.msrb.mxu0 %v2769_v44 }
 0x1e4   :  { %2122 = vmatpush.msk.msra.mxu2 %vm123_vm0, %v2121_v13  ;;  %1556 = vmatpush.msrb.mxu3 %v3119_v24 }
 0x1e5   :  { %1676 = vmatpush.msrb.mxu0 %v2781_v46 }
 0x1e6   :  { %1586 = vmatpush.msra.mxu2 %v3126_v58  ;;  %2129 = vmatpush.msk.msra.mxu3 %vm123_vm0, %v2128_v12 }
 0x1e7   :  { %v985_v62 = vpop.f32.mrf.mxu3  ;;  %1677 = vmatpush.msrb.mxu0 %v2791_v48  ;;  %v3223_v48 = vld [vmem:[%s3327_s6] sm:$0x1] }
 0x1e8   :  { %1587 = vmatpush.msra.mxu2 %v3137_v14  ;;  %1619 = vmatpush.msra.mxu3 %v3142_v30 }
 0x1e9   :  { %2109 = vmatmul.msk.f32.vlgmr.msrb.gmra.mxu2 %vm1369_vm10, %v1502_v38  ;;  %1678 = vmatpush.msrb.mxu0 %v2803_v49 }
 0x1ea   :  { %1620 = vmatpush.msra.mxu3 %v3149_v23  ;;  %1588 = vmatpush.msra.mxu2 %v3156_v43 }
 0x1eb   :  { %2116 = vmatmul.msk.f32.vlgmr.msrb.gmra.mxu3 %vm1369_vm10, %v1535_v19  ;;  %1679 = vmatpush.msrb.mxu0 %v2819_v51  ;;  %v1699_v51 = vld [vmem:[%s3326_s5 + $0x20] sm:$0xf] }
 0x1ec   :  { %1589 = vmatpush.msra.mxu2 %v3163_v20  ;;  %1621 = vmatpush.msra.mxu3 %v3168_v37 }
 0x1ed   :  { %1680 = vmatpush.msrb.mxu0 %v2831_v56 }
 0x1ee   :  { %1622 = vmatpush.msra.mxu3 %v3175_v39  ;;  %2132 = vmatpush.msk.msrb.mxu2 %vm123_vm0, %v1699_v51 }
 0x1ef   :  { %v1125_v13 = vpop.f32.mrf.mxu3  ;;  %1681 = vmatpush.msrb.mxu0 %v2841_v60 }
 0x1f0   :  { %1718 = vmatpush.msrb.mxu2 %v2957_v32 }
 0x1f1   :  { %2123 = vmatmul.msk.f32.vlgmr.msra.gmra.mxu2 %vm1369_vm10, %v1568_v50  ;;  %1682 = vmatpush.msrb.mxu0 %v2853_v63 }
 0x1f2   :  { %1719 = vmatpush.msrb.mxu2 %v2965_v57 }
 0x1f3   :  { %2130 = vmatmul.msk.f32.vlgmr.msra.gmra.mxu3 %vm1369_vm10, %v1601_v34  ;;  %1683 = vmatpush.msrb.mxu0 %v2867_v4  ;;  %v711_v4 = vadd.f32 %v705_v35, %v2947_v7 }
 0x1f4   :  { %1720 = vmatpush.msrb.mxu2 %v2977_v27 }
 0x1f5   :  { %1684 = vmatpush.msrb.mxu0 %v2879_v9 }
 0x1f6   :  { %1721 = vmatpush.msrb.mxu2 %v2989_v31  ;;  %v2138_v31 = vld [vmem:[%s3326_s5 + $0x48] sm:$0xf] }
 0x1f7   :  { %v1265_v5 = vpop.f32.mrf.mxu3  ;;  %1685 = vmatpush.msrb.mxu0 %v2889_v10  ;;  %2139 = vmatpush.msk.msrb.mxu3 %vm123_vm0, %v2138_v31 }
 0x1f9   :  { %1686 = vmatpush.msrb.mxu0 %v2898_v8  ;;  %v851_v8 = vadd.f32 %v845_v40, %v711_v4  ;;  %v2173_v40 = vld [vmem:[%s3326_s5 + $0x110] sm:$0xf]  ;;  %1750 = vmatpush.msrb.mxu3 %v2972_v21  ;;  %v2152_v21 = vld [vmem:[%s3326_s5 + $0x98] sm:$0xf] }
 0x1fa   :  { %2174 = vmatpush.msk.msrb.mxu1 %vm123_vm0, %v2173_v40 }
 0x1fb   :  { %1687 = vmatpush.msrb.mxu0 %v2904_v25  ;;  %1751 = vmatpush.msrb.mxu3 %v2982_v28  ;;  %v3274_v28 = vld [vmem:[%s3329_s8] sm:$0x1] }
 0x1fc   :  { %1910 = vmatpush.msrb.mxu1 %v3126_v58  ;;  %v2180_v58 = vld [vmem:[%s3326_s5 + $0x138] sm:$0xf] }
 0x1fd   :  { %1688 = vmatpush.msrb.mxu0 %v2910_v22  ;;  %1752 = vmatpush.msrb.mxu3 %v2994_v2 }
 0x1fe   :  { %1911 = vmatpush.msrb.mxu1 %v3137_v14 }
 0x1ff   :  { %1689 = vmatpush.msrb.mxu0 %v2916_v16  ;;  %1753 = vmatpush.msrb.mxu3 %v3007_v6 }
 0x200   :  { %1912 = vmatpush.msrb.mxu1 %v3156_v43 }
 0x201   :  { %1690 = vmatpush.msrb.mxu0 %v2922_v29  ;;  %v991_v29 = vadd.f32 %v985_v62, %v851_v8  ;;  %2153 = vmatpush.msk.msra.mxu3 %vm123_vm0, %v2152_v21 }
 0x202   :  { %1913 = vmatpush.msrb.mxu1 %v3163_v20 }
 0x203   :  { %v1131_v19 = vadd.f32 %v1125_v13, %v991_v29  ;;  %1814 = vmatpush.msra.mxu3 %v3028_v54 }
 0x205   :  { %v1271_v57 = vadd.f32 %v1265_v5, %v1131_v19  ;;  %1815 = vmatpush.msra.mxu3 %v3040_v11 }
 0x207   :  { %v1281_v27 = vadd.f32 %v2643_v15, %v1271_v57  ;;  %v2145_v15 = vld [vmem:[%s3326_s5 + $0x70] sm:$0xf]  ;;  %1816 = vmatpush.msra.mxu3 %v3052_v18  ;;  %v2166_v18 = vld [vmem:[%s3326_s5 + $0xe8] sm:$0xf] }
 0x208   :  { %2146 = vmatpush.msk.msra.mxu2 %vm123_vm0, %v2145_v15 }
 0x209   :  { %v1285_v35 = vmax.f32 %v1281_v27, 0.0  ;;  %1817 = vmatpush.msra.mxu3 %v3057_v26 }
 0x20a   :  { %1782 = vmatpush.msra.mxu2 %v3013_v33 }
 0x20c   :  { %1783 = vmatpush.msra.mxu2 %v3023_v36 }
 0x20e   :  { %1784 = vmatpush.msra.mxu2 %v3035_v1  ;;  %v2159_v1 = vld [vmem:[%s3326_s5 + $0xc0] sm:$0xf]  ;;  %s2230_s5 = smov [#allocation2]  }
 0x20f   :  { %s1981_s2 = sshll.u32 %s2230_s5, 4  ;;  %s1982_s2 = int_to_ptr.vmem [resolvable:$true] %s1981_s2 }
 0x210   :  { %1785 = vmatpush.msra.mxu2 %v3045_v17 }
 0x212   :  { %v1672_v33 = vpop.f32.mrf.mxu1 }
 0x25c   :  { %v1393_v44 = vpop.f32.mrf.mxu2 }
 0x25d   :  { %v1396_v49 = vadd.f32 %v1393_v44, %v3223_v48 }
 0x25e   :  { %v1426_v46 = vpop.f32.mrf.mxu3 }
 0x25f   :  { %v1429_v63 = vadd.f32 %v1426_v46, %v1396_v49 }
 0x264   :  { %v1459_v56 = vpop.f32.mrf.mxu2 }
 0x265   :  { %v1462_v9 = vadd.f32 %v1459_v56, %v1429_v63 }
 0x266   :  { %v1492_v60 = vpop.f32.mrf.mxu3 }
 0x267   :  { %v1495_v25 = vadd.f32 %v1492_v60, %v1462_v9 }
 0x26c   :  { %v1525_v10 = vpop.f32.mrf.mxu2 }
 0x26d   :  { %v1528_v16 = vadd.f32 %v1525_v10, %v1495_v25 }
 0x26e   :  { %v1558_v22 = vpop.f32.mrf.mxu3 }
 0x26f   :  { %v1561_v12 = vadd.f32 %v1558_v22, %v1528_v16 }
 0x274   :  { %v1591_v38 = vpop.f32.mrf.mxu2 }
 0x275   :  { %v1594_v32 = vadd.f32 %v1591_v38, %v1561_v12 }
 0x276   :  { %v1624_v50 = vpop.f32.mrf.mxu3 }
 0x277   :  { %v1627_v34 = vadd.f32 %v1624_v50, %v1594_v32 }
 0x279   :  { %v1628_v7 = vmax.f32 %v1627_v34, 0.0 }
 0x27b   :  { %2131 = vmatmul.msk.f32.vlgmr.msra.gmra.mxu0 %vm1629_vm11, %v1628_v7 }
 0x283   :  { %1691 = vmatmul.f32.vlgmr.msrb.gmra.mxu0 %v1285_v35 }
 0x2f8   :  { %v1650_v2 = vpop.f32.mrf.mxu0 }
 0x2f9   :  { %v1651_v6 = vadd.f32 %v1650_v2, %v3274_v28 }
 0x2fb   :  { %1654 = vst.msk [vmem:[#allocation2] sm:$0x1] %vm1653_vm12, %v1651_v6 }
 0x300   :  { %v1692_v36 = vpop.f32.mrf.mxu0 }
 0x301   :  { %v1693_v54 = vadd.f32 %v1692_v36, %v1672_v33 }
 0x303   :  { %2133 = vmatmul.msk.f32.vlgmr.msrb.gmra.mxu2 %vm1369_vm10, %v1693_v54  ;;  %v1732_v11 = vrot.slane %v1693_v54, 1  ;;  %v1892_v17 = vrot.slane %v1693_v54, 6  ;;  %v1764_v26 = vrot.slane %v1693_v54, 2  ;;  %v1796_v14 = vrot.slane %v1693_v54, 3 }
 0x304   :  { %2160 = vmatpush.msk.msrb.mxu2 %vm123_vm0, %v2159_v1 }
 0x305   :  { %2140 = vmatmul.msk.f32.vlgmr.msrb.gmra.mxu3 %vm1369_vm10, %v1732_v11  ;;  %2175 = vmatmul.msk.f32.vlgmr.msrb.gmra.mxu1 %vm1369_vm10, %v1892_v17 }
 0x306   :  { %1846 = vmatpush.msrb.mxu2 %v3069_v47  ;;  %2167 = vmatpush.msk.msrb.mxu3 %vm123_vm0, %v2166_v18  ;;  %v1828_v47 = vrot.slane %v1693_v54, 4 }
 0x308   :  { %1847 = vmatpush.msrb.mxu2 %v3079_v53  ;;  %1878 = vmatpush.msrb.mxu3 %v3084_v61  ;;  %v1860_v53 = vrot.slane %v1693_v54, 5  ;;  %v1924_v61 = vrot.slane %v1693_v54, 7 }
 0x30a   :  { %1848 = vmatpush.msrb.mxu2 %v3091_v59  ;;  %1879 = vmatpush.msrb.mxu3 %v3096_v52 }
 0x30b   :  { %2147 = vmatmul.msk.f32.vlgmr.msra.gmra.mxu2 %vm1369_vm10, %v1764_v26 }
 0x30c   :  { %1849 = vmatpush.msrb.mxu2 %v3103_v0  ;;  %1880 = vmatpush.msrb.mxu3 %v3108_v3 }
 0x30d   :  { %2154 = vmatmul.msk.f32.vlgmr.msra.gmra.mxu3 %vm1369_vm10, %v1796_v14 }
 0x30e   :  { %2181 = vmatpush.msk.msra.mxu2 %vm123_vm0, %v2180_v58  ;;  %1881 = vmatpush.msrb.mxu3 %v3119_v24 }
 0x310   :  { %1942 = vmatpush.msra.mxu2 %v3142_v30  ;;  %1967 = vmatpush.msra.mxu3 %v3185_v42 }
 0x312   :  { %1943 = vmatpush.msra.mxu2 %v3149_v23  ;;  %1968 = vmatpush.msra.mxu3 %v3191_v45 }
 0x313   :  { %2161 = vmatmul.msk.f32.vlgmr.msrb.gmra.mxu2 %vm1369_vm10, %v1828_v47 }
 0x314   :  { %1969 = vmatpush.msra.mxu3 %v3196_v41  ;;  %1944 = vmatpush.msra.mxu2 %v3168_v37 }
 0x315   :  { %2168 = vmatmul.msk.f32.vlgmr.msrb.gmra.mxu3 %vm1369_vm10, %v1860_v53 }
 0x316   :  { %1945 = vmatpush.msra.mxu2 %v3175_v39  ;;  %1970 = vmatpush.msra.mxu3 %v3202_v55 }
 0x31b   :  { %2182 = vmatmul.msk.f32.vlgmr.msra.gmra.mxu2 %vm1369_vm10, %v1924_v61 }
 0x382   :  { %v1915_v41 = vpop.f32.mrf.mxu1 }
 0x386   :  { %v1723_v59 = vpop.f32.mrf.mxu2 }
 0x387   :  { %v1726_v0 = vadd.f32 %v1723_v59, %v3223_v48 }
 0x388   :  { %v1755_v52 = vpop.f32.mrf.mxu3 }
 0x389   :  { %v1758_v24 = vadd.f32 %v1755_v52, %v1726_v0 }
 0x38e   :  { %v1787_v3 = vpop.f32.mrf.mxu2 }
 0x38f   :  { %v1790_v23 = vadd.f32 %v1787_v3, %v1758_v24 }
 0x390   :  { %v1819_v30 = vpop.f32.mrf.mxu3 }
 0x391   :  { %v1822_v43 = vadd.f32 %v1819_v30, %v1790_v23 }
 0x396   :  { %v1851_v20 = vpop.f32.mrf.mxu2 }
 0x397   :  { %v1854_v37 = vadd.f32 %v1851_v20, %v1822_v43 }
 0x398   :  { %v1883_v42 = vpop.f32.mrf.mxu3 }
 0x399   :  { %v1886_v45 = vadd.f32 %v1883_v42, %v1854_v37 }
 0x39b   :  { %v1918_v39 = vadd.f32 %v1915_v41, %v1886_v45 }
 0x39e   :  { %v1947_v62 = vpop.f32.mrf.mxu2 }
 0x39f   :  { %v1950_v55 = vadd.f32 %v1947_v62, %v1918_v39 }
 0x3a1   :  { %v1951_v13 = vmax.f32 %v1950_v55, 0.0 }
 0x3a3   :  { %2183 = vmatmul.msk.f32.vlgmr.msra.gmra.mxu3 %vm1629_vm11, %v1951_v13 }
 0x426   :  { %v1972_v5 = vpop.f32.mrf.mxu3 }
 0x427   :  { %v1973_v44 = vadd.f32 %v1972_v5, %v3274_v28 }
 0x429   :  { %1975 = vst.msk [vmem:[#allocation2 + $0x1] sm:$0x1] %vm1653_vm12, %v1973_v44 }
 0x42a   :  { %1986 = dma.vmem_to_hbm [thread:$0]  %s1982_s2, 32, %s1984_s26, [#allocation3]  }
 0x42b   :  { %2219 = dma.done.wait [#allocation3], 32  }
 0x42c   :  { %2220 = vsyncadd [#allocation3], 4294967264 }
 0x42d   :  { %1991 = vsyncpa [#allocation3], 1 }

</bundles_post_ra>
